<compile_context>
chip_gen: v7x
topology: tpu7x:2x2x1
jax: 0.10.0
libtpu: 0.0.40
codegen_flags: <defaults>
</compile_context>

<pallas_src>
import functools
import math

import jax
import jax.numpy as jnp
from jax.experimental import pallas as pl
from jax.experimental.pallas import tpu as pltpu


# --------------------------- pass 1: hypernetwork ----------------------------
def _hypernet_kernel(wl_ref, sub_w_ref, gen_w_ref, bias_par_ref,
                     w_out_ref, b_out_ref, *, num_adjacent, q_scale):
    """Generate the four student weight/bias tensors from the teacher subsets.

    wl_ref       (2, 4, L)       SMEM  layer-mix coeffs: [0]=weights, [1]=biases
    sub_w_ref    (4, L, H, H)    VMEM  teacher weight subsets (PyTorch (out, in) layout)
    gen_w_ref    (2, 4, H, H)    VMEM  WeightGenerator W ([0]) / B ([1])
    bias_par_ref (4, L+2, H, 1)  VMEM  rows 0..L-1 teacher bias subsets, L: gen W, L+1: gen B
    w_out_ref    (4, H, H) bf16  generated weights (score scale folded into index 0 = query)
    b_out_ref    (4, H, 1) f32   generated biases  (same folding for index 0)
    """
    for i in range(4):
        w_acc = wl_ref[0, i, 0] * sub_w_ref[i, 0]
        b_acc = wl_ref[1, i, 0] * bias_par_ref[i, 0]
        for l in range(1, num_adjacent):
            w_acc = w_acc + wl_ref[0, i, l] * sub_w_ref[i, l]
            b_acc = b_acc + wl_ref[1, i, l] * bias_par_ref[i, l]
        w = jnp.tanh(w_acc) * gen_w_ref[0, i] + gen_w_ref[1, i]
        b = jnp.tanh(b_acc) * bias_par_ref[i, num_adjacent] + bias_par_ref[i, num_adjacent + 1]
        if i == 0:  # fold 1/sqrt(head_dim) into the query projection (once, O(H^2))
            w = w * q_scale
            b = b * q_scale
        w_out_ref[i] = w.astype(w_out_ref.dtype)
        b_out_ref[i] = b


# ---------------------- pass 2: fused attention + LN -------------------------
def _attention_kernel(xt_ref, mask_ref, w_ref, b_ref, ln_ref, out_ref,
                      *, num_heads, head_dim, eps):
    """One batch element per grid step, feature-major activation layout.

    xt_ref   (H, S) f32    hidden states, transposed
    mask_ref (1, S) f32    additive attention mask over key positions
    w_ref    (4, H, H) bf16  generated [q, k, v, out] weights (query pre-scaled)
    b_ref    (4, H, 1) f32   generated biases
    ln_ref   (2, H, 1) f32   LayerNorm gamma / beta
    out_ref  (H, S) f32    output (transposed)
    """
    f32, bf16 = jnp.float32, jnp.bfloat16
    H, S = xt_ref.shape
    nh, hd = num_heads, head_dim

    xt = xt_ref[...]                      # (H, S) f32 (kept for the residual)
    xt_bf = xt.astype(bf16)

    def proj(i):
        # W (out, in) @ x^T (in, S) -> (out, S); bf16 operands, f32 accumulation.
        y = jax.lax.dot_general(w_ref[i], xt_bf, (((1,), (0,)), ((), ())),
                                preferred_element_type=f32)
        return y + b_ref[i]

    q_t = proj(0)                         # (H, S); score scale already folded in
    k_t = proj(1)
    v_t = proj(2)

    # Head split: (H, S) -> (nh, hd, S).  Lane dim untouched, split lands on
    # sublane-tile boundaries -> pure tile re-indexing, no relayout copies.
    qh = q_t.reshape(nh, hd, S).astype(bf16)
    kh = k_t.reshape(nh, hd, S).astype(bf16)
    vh = v_t.reshape(nh, hd, S).astype(bf16)

    # scores[n, q, k] = sum_d qh[n, d, q] * kh[n, d, k]  -- one head-batched MXU call.
    scores = jax.lax.dot_general(qh, kh, (((1,), (1,)), ((0,), (0,))),
                                 preferred_element_type=f32)       # (nh, S, S)
    scores = scores + mask_ref[...]       # additive mask, broadcast over heads/queries once

    # Numerically-stable softmax; the divide goes to the EUP (approx reciprocal).
    scores = scores - jnp.max(scores, axis=-1, keepdims=True)
    p = jnp.exp(scores)
    p = p * pl.reciprocal(jnp.sum(p, axis=-1, keepdims=True), approx=True)
    # TODO(synk): attention-probs dropout (training mode) not implemented.

    # ctx_t[n, d, q] = sum_k vh[n, d, k] * p[n, q, k]    -- head-batched MXU call.
    ctx_t = jax.lax.dot_general(vh, p.astype(bf16), (((2,), (2,)), ((0,), (0,))),
                                preferred_element_type=f32)        # (nh, hd, S)

    # Merge heads (tile-aligned reshape) and do ONE K=H output projection.
    ctx_flat = ctx_t.reshape(nh * hd, S).astype(bf16)              # (H, S)
    attn_t = jax.lax.dot_general(w_ref[3], ctx_flat, (((1,), (0,)), ((), ())),
                                 preferred_element_type=f32) + b_ref[3]   # (H, S)
    # TODO(synk): hidden dropout (training mode) not implemented.

    # Residual + LayerNorm over the feature axis (axis 0 in this layout).
    y = attn_t + xt
    mu = jnp.mean(y, axis=0, keepdims=True)
    yc = y - mu
    var = jnp.mean(yc * yc, axis=0, keepdims=True)
    out_ref[...] = (yc * jax.lax.rsqrt(var + eps) * ln_ref[0] + ln_ref[1]).astype(out_ref.dtype)


# -------------------------------- host wrapper --------------------------------
def student_bert_attention(hidden_states, attention_mask_add, params, *, num_heads, eps=1e-12):
    """hidden_states: (B, S, H) f32; attention_mask_add: (B, S) additive mask."""
    B, S, H = hidden_states.shape
    assert H % num_heads == 0
    head_dim = H // num_heads
    names = ("query", "key", "value", "output")
    L = params["query"]["sub_w"].shape[-1]

    # --- pack the hypernetwork inputs into a few slabs (cuts DMA count) -------
    # Teacher weight subsets, layer axis leading, PyTorch (out, in) layout kept.
    sub_w = jnp.stack([jnp.transpose(params[n]["sub_w"], (2, 0, 1)) for n in names])  # (4,L,H,H)
    gen_w = jnp.stack([jnp.stack([params[n]["gen_w_W"] for n in names]),
                       jnp.stack([params[n]["gen_w_B"] for n in names])])             # (2,4,H,H)
    bias_par = jnp.stack([
        jnp.concatenate([params[n]["sub_b"].T.reshape(L, H, 1),
                         params[n]["gen_b_W"].reshape(1, H, 1),
                         params[n]["gen_b_B"].reshape(1, H, 1)], axis=0)
        for n in names])                                                               # (4,L+2,H,1)
    wl = jnp.stack([jnp.stack([params[n]["wl_w"][:, 0] for n in names]),
                    jnp.stack([params[n]["wl_b"][:, 0] for n in names])])              # (2,4,L)
    ln = jnp.stack([params["ln_gamma"].reshape(H, 1),
                    params["ln_beta"].reshape(H, 1)])                                  # (2,H,1)
    mask = attention_mask_add.reshape(B, 1, S).astype(jnp.float32)                     # (B,1,S)
    x_t = jnp.transpose(hidden_states, (0, 2, 1))                                      # (B,H,S)

    vmem = pl.BlockSpec(memory_space=pltpu.MemorySpace.VMEM)
    smem = pl.BlockSpec(memory_space=pltpu.MemorySpace.SMEM)

    # --- pass 1: generate student weights / biases once (not per batch/tile) ---
    w_gen, b_gen = pl.pallas_call(
        functools.partial(_hypernet_kernel, num_adjacent=L, q_scale=1.0 / math.sqrt(head_dim)),
        out_shape=(jax.ShapeDtypeStruct((4, H, H), jnp.bfloat16),
                   jax.ShapeDtypeStruct((4, H, 1), jnp.float32)),
        in_specs=[smem, vmem, vmem, vmem],
        out_specs=(vmem, vmem),
    )(wl, sub_w, gen_w, bias_par)

    # --- pass 2: fused attention + output projection + residual LayerNorm ------
    # Grid over batch marked "parallel" (2 TCs on v7x); weights/biases/LN params
    # stay VMEM-resident across the grid (constant index_map).
    out_t = pl.pallas_call(
        functools.partial(_attention_kernel, num_heads=num_heads, head_dim=head_dim, eps=eps),
        out_shape=jax.ShapeDtypeStruct((B, H, S), jnp.float32),
        grid=(B,),
        in_specs=[
            pl.BlockSpec((None, H, S), lambda b: (b, 0, 0)),   # x^T
            pl.BlockSpec((None, 1, S), lambda b: (b, 0, 0)),   # additive mask
            pl.BlockSpec((4, H, H), lambda b: (0, 0, 0)),      # generated weights (resident)
            pl.BlockSpec((4, H, 1), lambda b: (0, 0, 0)),      # generated biases  (resident)
            pl.BlockSpec((2, H, 1), lambda b: (0, 0, 0)),      # LayerNorm params  (resident)
        ],
        out_specs=pl.BlockSpec((None, H, S), lambda b: (b, 0, 0)),
        compiler_params=pltpu.CompilerParams(dimension_semantics=("parallel",)),
    )(x_t, mask, w_gen, b_gen, ln)

    return jnp.transpose(out_t, (0, 2, 1))                     # back to (B, S, H)


# ----------------------------- pure-JAX reference -----------------------------
def _reference(x, mask_add, params, num_heads, eps):
    # Matches the module math; matmul operands cast to bf16 with f32 accumulation to
    # mirror the kernel's MXU numerics (no HIGHEST precision, per the perf review).
    B, S, H = x.shape
    hd = H // num_heads
    f32, bf16 = jnp.float32, jnp.bfloat16

    def gen(p):
        w = jnp.tanh((p["sub_w"] * p["wl_w"][:, 0]).sum(-1)) * p["gen_w_W"] + p["gen_w_B"]
        b = jnp.tanh((p["sub_b"] * p["wl_b"][:, 0]).sum(-1)) * p["gen_b_W"] + p["gen_b_B"]
        return w, b

    def linear(inp, p):
        w, b = gen(p)
        return jnp.einsum("bsh,oh->bso", inp.astype(bf16), w.astype(bf16),
                          preferred_element_type=f32) + b

    q = linear(x, params["query"])
    k = linear(x, params["key"])
    v = linear(x, params["value"])

    def split(t):
        return t.reshape(B, S, num_heads, hd).transpose(0, 2, 1, 3)

    qh, kh, vh = split(q), split(k), split(v)
    scores = jnp.einsum("bhqd,bhkd->bhqk", qh.astype(bf16), kh.astype(bf16),
                        preferred_element_type=f32) / math.sqrt(hd)
    scores = scores + mask_add[:, None, None, :]
    probs = jax.nn.softmax(scores, axis=-1)
    ctx = jnp.einsum("bhqk,bhkd->bhqd", probs.astype(bf16), vh.astype(bf16),
                     preferred_element_type=f32)
    ctx = ctx.transpose(0, 2, 1, 3).reshape(B, S, H)
    attn = linear(ctx, params["output"])
    y = attn + x
    mu = jnp.mean(y, -1, keepdims=True)
    var = jnp.mean((y - mu) ** 2, -1, keepdims=True)
    return (y - mu) * jax.lax.rsqrt(var + eps) * params["ln_gamma"] + params["ln_beta"]


# -------------------------------------- main ----------------------------------
if __name__ == "__main__":
    B, S, H = 2, 8, 64
    NUM_HEADS = 4          # head_dim = 16 -> 1/sqrt(hd) = 0.25 (exact power of two)
    L = 3                  # number of adjacent teacher layers feeding this student layer
    EPS = 1e-12

    keys = iter(jax.random.split(jax.random.PRNGKey(0), 48))

    def make_proj_params():
        return dict(
            sub_w=0.25 * jax.random.normal(next(keys), (H, H, L), jnp.float32),
            wl_w=jax.random.normal(next(keys), (L, 1), jnp.float32),
            gen_w_W=1.0 + 0.1 * jax.random.normal(next(keys), (H, H), jnp.float32),
            gen_w_B=0.1 * jax.random.normal(next(keys), (H, H), jnp.float32),
            sub_b=0.25 * jax.random.normal(next(keys), (H, L), jnp.float32),
            wl_b=jax.random.normal(next(keys), (L, 1), jnp.float32),
            gen_b_W=1.0 + 0.1 * jax.random.normal(next(keys), (H,), jnp.float32),
            gen_b_B=0.1 * jax.random.normal(next(keys), (H,), jnp.float32),
        )

    params = {n: make_proj_params() for n in ("query", "key", "value", "output")}
    params["ln_gamma"] = 1.0 + 0.1 * jax.random.normal(next(keys), (H,), jnp.float32)
    params["ln_beta"] = 0.1 * jax.random.normal(next(keys), (H,), jnp.float32)

    hidden_states = 0.5 * jax.random.normal(next(keys), (B, S, H), jnp.float32)

    # Additive attention mask: batch 1 has its last two key positions padded out.
    pad = jnp.zeros((B, S), jnp.float32).at[1, S - 2:].set(1.0)
    attention_mask_add = pad * -10000.0

    out = student_bert_attention(hidden_states, attention_mask_add, params,
                                 num_heads=NUM_HEADS, eps=EPS)
    out = jax.block_until_ready(out)

    ref = _reference(hidden_states, attention_mask_add, params, NUM_HEADS, EPS)
    assert out.shape == (B, S, H)
    # Tolerance sized for bf16 matmul operands (f32 accumulate) + the EUP approximate
    # reciprocal in the softmax; a structural bug would show up as O(0.1-1) errors.
    max_diff = float(jnp.max(jnp.abs(out - ref)))
    assert bool(jnp.allclose(out, ref, atol=1e-2, rtol=1e-2)), f"mismatch: max|diff|={max_diff}"

    print("KERNEL_OK")
</pallas_src>

<mosaic_0001>
module attributes {stable_mosaic.version = 11 : i64} {
  func.func @_hypernet_kernel(%arg0: memref<2x4x3xf32, #tpu.memory_space<smem>>, %arg1: memref<4x3x64x64xf32, #tpu.memory_space<vmem>>, %arg2: memref<2x4x64x64xf32, #tpu.memory_space<vmem>>, %arg3: memref<4x5x64x1xf32, #tpu.memory_space<vmem>>, %arg4: memref<4x64x64xbf16, #tpu.memory_space<vmem>>, %arg5: memref<4x64x1xf32, #tpu.memory_space<vmem>>) attributes {dimension_semantics = [], scalar_prefetch = 0 : i64, scratch_operands = 0 : i64, tpu.core_type = #tpu.core_type<tc>} {
    %c0 = arith.constant 0 : index
    %c0_0 = arith.constant 0 : index
    %c0_1 = arith.constant 0 : index
    %0 = memref.load %arg0[%c0, %c0_0, %c0_1] : memref<2x4x3xf32, #tpu.memory_space<smem>>
    %c0_2 = arith.constant 0 : index
    %c0_3 = arith.constant 0 : index
    %c0_4 = arith.constant 0 : index
    %c0_5 = arith.constant 0 : index
    %1 = vector.load %arg1[%c0_2, %c0_3, %c0_4, %c0_5] : memref<4x3x64x64xf32, #tpu.memory_space<vmem>>, vector<1x1x64x64xf32>
    %2 = vector.shape_cast %1 : vector<1x1x64x64xf32> to vector<64x64xf32>
    %3 = vector.broadcast %0 : f32 to vector<64x64xf32>
    %4 = arith.mulf %3, %2 : vector<64x64xf32>
    %c1 = arith.constant 1 : index
    %c0_6 = arith.constant 0 : index
    %c0_7 = arith.constant 0 : index
    %5 = memref.load %arg0[%c1, %c0_6, %c0_7] : memref<2x4x3xf32, #tpu.memory_space<smem>>
    %c0_8 = arith.constant 0 : index
    %c0_9 = arith.constant 0 : index
    %c0_10 = arith.constant 0 : index
    %c0_11 = arith.constant 0 : index
    %6 = vector.load %arg3[%c0_8, %c0_9, %c0_10, %c0_11] : memref<4x5x64x1xf32, #tpu.memory_space<vmem>>, vector<1x1x64x1xf32>
    %7 = vector.shape_cast %6 : vector<1x1x64x1xf32> to vector<64x1xf32>
    %8 = vector.broadcast %5 : f32 to vector<64x1xf32>
    %9 = arith.mulf %8, %7 : vector<64x1xf32>
    %c0_12 = arith.constant 0 : index
    %c0_13 = arith.constant 0 : index
    %c1_14 = arith.constant 1 : index
    %10 = memref.load %arg0[%c0_12, %c0_13, %c1_14] : memref<2x4x3xf32, #tpu.memory_space<smem>>
    %c0_15 = arith.constant 0 : index
    %c1_16 = arith.constant 1 : index
    %c0_17 = arith.constant 0 : index
    %c0_18 = arith.constant 0 : index
    %11 = vector.load %arg1[%c0_15, %c1_16, %c0_17, %c0_18] : memref<4x3x64x64xf32, #tpu.memory_space<vmem>>, vector<1x1x64x64xf32>
    %12 = vector.shape_cast %11 : vector<1x1x64x64xf32> to vector<64x64xf32>
    %13 = vector.broadcast %10 : f32 to vector<64x64xf32>
    %14 = arith.mulf %13, %12 : vector<64x64xf32>
    %15 = arith.addf %4, %14 : vector<64x64xf32>
    %c1_19 = arith.constant 1 : index
    %c0_20 = arith.constant 0 : index
    %c1_21 = arith.constant 1 : index
    %16 = memref.load %arg0[%c1_19, %c0_20, %c1_21] : memref<2x4x3xf32, #tpu.memory_space<smem>>
    %c0_22 = arith.constant 0 : index
    %c1_23 = arith.constant 1 : index
    %c0_24 = arith.constant 0 : index
    %c0_25 = arith.constant 0 : index
    %17 = vector.load %arg3[%c0_22, %c1_23, %c0_24, %c0_25] : memref<4x5x64x1xf32, #tpu.memory_space<vmem>>, vector<1x1x64x1xf32>
    %18 = vector.shape_cast %17 : vector<1x1x64x1xf32> to vector<64x1xf32>
    %19 = vector.broadcast %16 : f32 to vector<64x1xf32>
    %20 = arith.mulf %19, %18 : vector<64x1xf32>
    %21 = arith.addf %9, %20 : vector<64x1xf32>
    %c0_26 = arith.constant 0 : index
    %c0_27 = arith.constant 0 : index
    %c2 = arith.constant 2 : index
    %22 = memref.load %arg0[%c0_26, %c0_27, %c2] : memref<2x4x3xf32, #tpu.memory_space<smem>>
    %c0_28 = arith.constant 0 : index
    %c2_29 = arith.constant 2 : index
    %c0_30 = arith.constant 0 : index
    %c0_31 = arith.constant 0 : index
    %23 = vector.load %arg1[%c0_28, %c2_29, %c0_30, %c0_31] : memref<4x3x64x64xf32, #tpu.memory_space<vmem>>, vector<1x1x64x64xf32>
    %24 = vector.shape_cast %23 : vector<1x1x64x64xf32> to vector<64x64xf32>
    %25 = vector.broadcast %22 : f32 to vector<64x64xf32>
    %26 = arith.mulf %25, %24 : vector<64x64xf32>
    %27 = arith.addf %15, %26 : vector<64x64xf32>
    %c1_32 = arith.constant 1 : index
    %c0_33 = arith.constant 0 : index
    %c2_34 = arith.constant 2 : index
    %28 = memref.load %arg0[%c1_32, %c0_33, %c2_34] : memref<2x4x3xf32, #tpu.memory_space<smem>>
    %c0_35 = arith.constant 0 : index
    %c2_36 = arith.constant 2 : index
    %c0_37 = arith.constant 0 : index
    %c0_38 = arith.constant 0 : index
    %29 = vector.load %arg3[%c0_35, %c2_36, %c0_37, %c0_38] : memref<4x5x64x1xf32, #tpu.memory_space<vmem>>, vector<1x1x64x1xf32>
    %30 = vector.shape_cast %29 : vector<1x1x64x1xf32> to vector<64x1xf32>
    %31 = vector.broadcast %28 : f32 to vector<64x1xf32>
    %32 = arith.mulf %31, %30 : vector<64x1xf32>
    %33 = arith.addf %21, %32 : vector<64x1xf32>
    %34 = math.tanh %27 : vector<64x64xf32>
    %c0_39 = arith.constant 0 : index
    %c0_40 = arith.constant 0 : index
    %c0_41 = arith.constant 0 : index
    %c0_42 = arith.constant 0 : index
    %35 = vector.load %arg2[%c0_39, %c0_40, %c0_41, %c0_42] : memref<2x4x64x64xf32, #tpu.memory_space<vmem>>, vector<1x1x64x64xf32>
    %36 = vector.shape_cast %35 : vector<1x1x64x64xf32> to vector<64x64xf32>
    %37 = arith.mulf %34, %36 : vector<64x64xf32>
    %c1_43 = arith.constant 1 : index
    %c0_44 = arith.constant 0 : index
    %c0_45 = arith.constant 0 : index
    %c0_46 = arith.constant 0 : index
    %38 = vector.load %arg2[%c1_43, %c0_44, %c0_45, %c0_46] : memref<2x4x64x64xf32, #tpu.memory_space<vmem>>, vector<1x1x64x64xf32>
    %39 = vector.shape_cast %38 : vector<1x1x64x64xf32> to vector<64x64xf32>
    %40 = arith.addf %37, %39 : vector<64x64xf32>
    %41 = math.tanh %33 : vector<64x1xf32>
    %c0_47 = arith.constant 0 : index
    %c3 = arith.constant 3 : index
    %c0_48 = arith.constant 0 : index
    %c0_49 = arith.constant 0 : index
    %42 = vector.load %arg3[%c0_47, %c3, %c0_48, %c0_49] : memref<4x5x64x1xf32, #tpu.memory_space<vmem>>, vector<1x1x64x1xf32>
    %43 = vector.shape_cast %42 : vector<1x1x64x1xf32> to vector<64x1xf32>
    %44 = arith.mulf %41, %43 : vector<64x1xf32>
    %c0_50 = arith.constant 0 : index
    %c4 = arith.constant 4 : index
    %c0_51 = arith.constant 0 : index
    %c0_52 = arith.constant 0 : index
    %45 = vector.load %arg3[%c0_50, %c4, %c0_51, %c0_52] : memref<4x5x64x1xf32, #tpu.memory_space<vmem>>, vector<1x1x64x1xf32>
    %46 = vector.shape_cast %45 : vector<1x1x64x1xf32> to vector<64x1xf32>
    %47 = arith.addf %44, %46 : vector<64x1xf32>
    %cst = arith.constant 2.500000e-01 : f32
    %48 = vector.broadcast %cst : f32 to vector<64x64xf32>
    %49 = arith.mulf %40, %48 : vector<64x64xf32>
    %cst_53 = arith.constant 2.500000e-01 : f32
    %50 = vector.broadcast %cst_53 : f32 to vector<64x1xf32>
    %51 = arith.mulf %47, %50 : vector<64x1xf32>
    %52 = arith.truncf %49 : vector<64x64xf32> to vector<64x64xbf16>
    %c0_54 = arith.constant 0 : index
    %c0_55 = arith.constant 0 : index
    %c0_56 = arith.constant 0 : index
    %53 = vector.load %arg4[%c0_54, %c0_55, %c0_56] : memref<4x64x64xbf16, #tpu.memory_space<vmem>>, vector<1x64x64xbf16>
    %54 = vector.shape_cast %53 : vector<1x64x64xbf16> to vector<64x64xbf16>
    %55 = vector.shape_cast %52 : vector<64x64xbf16> to vector<1x64x64xbf16>
    tpu.vector_store %arg4[%c0_54, %c0_55, %c0_56], %55 {strides = array<i32>} : memref<4x64x64xbf16, #tpu.memory_space<vmem>>, vector<1x64x64xbf16>,
    %c0_57 = arith.constant 0 : index
    %c0_58 = arith.constant 0 : index
    %c0_59 = arith.constant 0 : index
    %56 = vector.load %arg5[%c0_57, %c0_58, %c0_59] : memref<4x64x1xf32, #tpu.memory_space<vmem>>, vector<1x64x1xf32>
    %57 = vector.shape_cast %56 : vector<1x64x1xf32> to vector<64x1xf32>
    %58 = vector.shape_cast %51 : vector<64x1xf32> to vector<1x64x1xf32>
    tpu.vector_store %arg5[%c0_57, %c0_58, %c0_59], %58 {strides = array<i32>} : memref<4x64x1xf32, #tpu.memory_space<vmem>>, vector<1x64x1xf32>,
    %c0_60 = arith.constant 0 : index
    %c1_61 = arith.constant 1 : index
    %c0_62 = arith.constant 0 : index
    %59 = memref.load %arg0[%c0_60, %c1_61, %c0_62] : memref<2x4x3xf32, #tpu.memory_space<smem>>
    %c1_63 = arith.constant 1 : index
    %c0_64 = arith.constant 0 : index
    %c0_65 = arith.constant 0 : index
    %c0_66 = arith.constant 0 : index
    %60 = vector.load %arg1[%c1_63, %c0_64, %c0_65, %c0_66] : memref<4x3x64x64xf32, #tpu.memory_space<vmem>>, vector<1x1x64x64xf32>
    %61 = vector.shape_cast %60 : vector<1x1x64x64xf32> to vector<64x64xf32>
    %62 = vector.broadcast %59 : f32 to vector<64x64xf32>
    %63 = arith.mulf %62, %61 : vector<64x64xf32>
    %c1_67 = arith.constant 1 : index
    %c1_68 = arith.constant 1 : index
    %c0_69 = arith.constant 0 : index
    %64 = memref.load %arg0[%c1_67, %c1_68, %c0_69] : memref<2x4x3xf32, #tpu.memory_space<smem>>
    %c1_70 = arith.constant 1 : index
    %c0_71 = arith.constant 0 : index
    %c0_72 = arith.constant 0 : index
    %c0_73 = arith.constant 0 : index
    %65 = vector.load %arg3[%c1_70, %c0_71, %c0_72, %c0_73] : memref<4x5x64x1xf32, #tpu.memory_space<vmem>>, vector<1x1x64x1xf32>
    %66 = vector.shape_cast %65 : vector<1x1x64x1xf32> to vector<64x1xf32>
    %67 = vector.broadcast %64 : f32 to vector<64x1xf32>
    %68 = arith.mulf %67, %66 : vector<64x1xf32>
    %c0_74 = arith.constant 0 : index
    %c1_75 = arith.constant 1 : index
    %c1_76 = arith.constant 1 : index
    %69 = memref.load %arg0[%c0_74, %c1_75, %c1_76] : memref<2x4x3xf32, #tpu.memory_space<smem>>
    %c1_77 = arith.constant 1 : index
    %c1_78 = arith.constant 1 : index
    %c0_79 = arith.constant 0 : index
    %c0_80 = arith.constant 0 : index
    %70 = vector.load %arg1[%c1_77, %c1_78, %c0_79, %c0_80] : memref<4x3x64x64xf32, #tpu.memory_space<vmem>>, vector<1x1x64x64xf32>
    %71 = vector.shape_cast %70 : vector<1x1x64x64xf32> to vector<64x64xf32>
    %72 = vector.broadcast %69 : f32 to vector<64x64xf32>
    %73 = arith.mulf %72, %71 : vector<64x64xf32>
    %74 = arith.addf %63, %73 : vector<64x64xf32>
    %c1_81 = arith.constant 1 : index
    %c1_82 = arith.constant 1 : index
    %c1_83 = arith.constant 1 : index
    %75 = memref.load %arg0[%c1_81, %c1_82, %c1_83] : memref<2x4x3xf32, #tpu.memory_space<smem>>
    %c1_84 = arith.constant 1 : index
    %c1_85 = arith.constant 1 : index
    %c0_86 = arith.constant 0 : index
    %c0_87 = arith.constant 0 : index
    %76 = vector.load %arg3[%c1_84, %c1_85, %c0_86, %c0_87] : memref<4x5x64x1xf32, #tpu.memory_space<vmem>>, vector<1x1x64x1xf32>
    %77 = vector.shape_cast %76 : vector<1x1x64x1xf32> to vector<64x1xf32>
    %78 = vector.broadcast %75 : f32 to vector<64x1xf32>
    %79 = arith.mulf %78, %77 : vector<64x1xf32>
    %80 = arith.addf %68, %79 : vector<64x1xf32>
    %c0_88 = arith.constant 0 : index
    %c1_89 = arith.constant 1 : index
    %c2_90 = arith.constant 2 : index
    %81 = memref.load %arg0[%c0_88, %c1_89, %c2_90] : memref<2x4x3xf32, #tpu.memory_space<smem>>
    %c1_91 = arith.constant 1 : index
    %c2_92 = arith.constant 2 : index
    %c0_93 = arith.constant 0 : index
    %c0_94 = arith.constant 0 : index
    %82 = vector.load %arg1[%c1_91, %c2_92, %c0_93, %c0_94] : memref<4x3x64x64xf32, #tpu.memory_space<vmem>>, vector<1x1x64x64xf32>
    %83 = vector.shape_cast %82 : vector<1x1x64x64xf32> to vector<64x64xf32>
    %84 = vector.broadcast %81 : f32 to vector<64x64xf32>
    %85 = arith.mulf %84, %83 : vector<64x64xf32>
    %86 = arith.addf %74, %85 : vector<64x64xf32>
    %c1_95 = arith.constant 1 : index
    %c1_96 = arith.constant 1 : index
    %c2_97 = arith.constant 2 : index
    %87 = memref.load %arg0[%c1_95, %c1_96, %c2_97] : memref<2x4x3xf32, #tpu.memory_space<smem>>
    %c1_98 = arith.constant 1 : index
    %c2_99 = arith.constant 2 : index
    %c0_100 = arith.constant 0 : index
    %c0_101 = arith.constant 0 : index
    %88 = vector.load %arg3[%c1_98, %c2_99, %c0_100, %c0_101] : memref<4x5x64x1xf32, #tpu.memory_space<vmem>>, vector<1x1x64x1xf32>
    %89 = vector.shape_cast %88 : vector<1x1x64x1xf32> to vector<64x1xf32>
    %90 = vector.broadcast %87 : f32 to vector<64x1xf32>
    %91 = arith.mulf %90, %89 : vector<64x1xf32>
    %92 = arith.addf %80, %91 : vector<64x1xf32>
    %93 = math.tanh %86 : vector<64x64xf32>
    %c0_102 = arith.constant 0 : index
    %c1_103 = arith.constant 1 : index
    %c0_104 = arith.constant 0 : index
    %c0_105 = arith.constant 0 : index
    %94 = vector.load %arg2[%c0_102, %c1_103, %c0_104, %c0_105] : memref<2x4x64x64xf32, #tpu.memory_space<vmem>>, vector<1x1x64x64xf32>
    %95 = vector.shape_cast %94 : vector<1x1x64x64xf32> to vector<64x64xf32>
    %96 = arith.mulf %93, %95 : vector<64x64xf32>
    %c1_106 = arith.constant 1 : index
    %c1_107 = arith.constant 1 : index
    %c0_108 = arith.constant 0 : index
    %c0_109 = arith.constant 0 : index
    %97 = vector.load %arg2[%c1_106, %c1_107, %c0_108, %c0_109] : memref<2x4x64x64xf32, #tpu.memory_space<vmem>>, vector<1x1x64x64xf32>
    %98 = vector.shape_cast %97 : vector<1x1x64x64xf32> to vector<64x64xf32>
    %99 = arith.addf %96, %98 : vector<64x64xf32>
    %100 = math.tanh %92 : vector<64x1xf32>
    %c1_110 = arith.constant 1 : index
    %c3_111 = arith.constant 3 : index
    %c0_112 = arith.constant 0 : index
    %c0_113 = arith.constant 0 : index
    %101 = vector.load %arg3[%c1_110, %c3_111, %c0_112, %c0_113] : memref<4x5x64x1xf32, #tpu.memory_space<vmem>>, vector<1x1x64x1xf32>
    %102 = vector.shape_cast %101 : vector<1x1x64x1xf32> to vector<64x1xf32>
    %103 = arith.mulf %100, %102 : vector<64x1xf32>
    %c1_114 = arith.constant 1 : index
    %c4_115 = arith.constant 4 : index
    %c0_116 = arith.constant 0 : index
    %c0_117 = arith.constant 0 : index
    %104 = vector.load %arg3[%c1_114, %c4_115, %c0_116, %c0_117] : memref<4x5x64x1xf32, #tpu.memory_space<vmem>>, vector<1x1x64x1xf32>
    %105 = vector.shape_cast %104 : vector<1x1x64x1xf32> to vector<64x1xf32>
    %106 = arith.addf %103, %105 : vector<64x1xf32>
    %107 = arith.truncf %99 : vector<64x64xf32> to vector<64x64xbf16>
    %c1_118 = arith.constant 1 : index
    %c0_119 = arith.constant 0 : index
    %c0_120 = arith.constant 0 : index
    %108 = vector.load %arg4[%c1_118, %c0_119, %c0_120] : memref<4x64x64xbf16, #tpu.memory_space<vmem>>, vector<1x64x64xbf16>
    %109 = vector.shape_cast %108 : vector<1x64x64xbf16> to vector<64x64xbf16>
    %110 = vector.shape_cast %107 : vector<64x64xbf16> to vector<1x64x64xbf16>
    tpu.vector_store %arg4[%c1_118, %c0_119, %c0_120], %110 {strides = array<i32>} : memref<4x64x64xbf16, #tpu.memory_space<vmem>>, vector<1x64x64xbf16>,
    %c1_121 = arith.constant 1 : index
    %c0_122 = arith.constant 0 : index
    %c0_123 = arith.constant 0 : index
    %111 = vector.load %arg5[%c1_121, %c0_122, %c0_123] : memref<4x64x1xf32, #tpu.memory_space<vmem>>, vector<1x64x1xf32>
    %112 = vector.shape_cast %111 : vector<1x64x1xf32> to vector<64x1xf32>
    %113 = vector.shape_cast %106 : vector<64x1xf32> to vector<1x64x1xf32>
    tpu.vector_store %arg5[%c1_121, %c0_122, %c0_123], %113 {strides = array<i32>} : memref<4x64x1xf32, #tpu.memory_space<vmem>>, vector<1x64x1xf32>,
    %c0_124 = arith.constant 0 : index
    %c2_125 = arith.constant 2 : index
    %c0_126 = arith.constant 0 : index
    %114 = memref.load %arg0[%c0_124, %c2_125, %c0_126] : memref<2x4x3xf32, #tpu.memory_space<smem>>
    %c2_127 = arith.constant 2 : index
    %c0_128 = arith.constant 0 : index
    %c0_129 = arith.constant 0 : index
    %c0_130 = arith.constant 0 : index
    %115 = vector.load %arg1[%c2_127, %c0_128, %c0_129, %c0_130] : memref<4x3x64x64xf32, #tpu.memory_space<vmem>>, vector<1x1x64x64xf32>
    %116 = vector.shape_cast %115 : vector<1x1x64x64xf32> to vector<64x64xf32>
    %117 = vector.broadcast %114 : f32 to vector<64x64xf32>
    %118 = arith.mulf %117, %116 : vector<64x64xf32>
    %c1_131 = arith.constant 1 : index
    %c2_132 = arith.constant 2 : index
    %c0_133 = arith.constant 0 : index
    %119 = memref.load %arg0[%c1_131, %c2_132, %c0_133] : memref<2x4x3xf32, #tpu.memory_space<smem>>
    %c2_134 = arith.constant 2 : index
    %c0_135 = arith.constant 0 : index
    %c0_136 = arith.constant 0 : index
    %c0_137 = arith.constant 0 : index
    %120 = vector.load %arg3[%c2_134, %c0_135, %c0_136, %c0_137] : memref<4x5x64x1xf32, #tpu.memory_space<vmem>>, vector<1x1x64x1xf32>
    %121 = vector.shape_cast %120 : vector<1x1x64x1xf32> to vector<64x1xf32>
    %122 = vector.broadcast %119 : f32 to vector<64x1xf32>
    %123 = arith.mulf %122, %121 : vector<64x1xf32>
    %c0_138 = arith.constant 0 : index
    %c2_139 = arith.constant 2 : index
    %c1_140 = arith.constant 1 : index
    %124 = memref.load %arg0[%c0_138, %c2_139, %c1_140] : memref<2x4x3xf32, #tpu.memory_space<smem>>
    %c2_141 = arith.constant 2 : index
    %c1_142 = arith.constant 1 : index
    %c0_143 = arith.constant 0 : index
    %c0_144 = arith.constant 0 : index
    %125 = vector.load %arg1[%c2_141, %c1_142, %c0_143, %c0_144] : memref<4x3x64x64xf32, #tpu.memory_space<vmem>>, vector<1x1x64x64xf32>
    %126 = vector.shape_cast %125 : vector<1x1x64x64xf32> to vector<64x64xf32>
    %127 = vector.broadcast %124 : f32 to vector<64x64xf32>
    %128 = arith.mulf %127, %126 : vector<64x64xf32>
    %129 = arith.addf %118, %128 : vector<64x64xf32>
    %c1_145 = arith.constant 1 : index
    %c2_146 = arith.constant 2 : index
    %c1_147 = arith.constant 1 : index
    %130 = memref.load %arg0[%c1_145, %c2_146, %c1_147] : memref<2x4x3xf32, #tpu.memory_space<smem>>
    %c2_148 = arith.constant 2 : index
    %c1_149 = arith.constant 1 : index
    %c0_150 = arith.constant 0 : index
    %c0_151 = arith.constant 0 : index
    %131 = vector.load %arg3[%c2_148, %c1_149, %c0_150, %c0_151] : memref<4x5x64x1xf32, #tpu.memory_space<vmem>>, vector<1x1x64x1xf32>
    %132 = vector.shape_cast %131 : vector<1x1x64x1xf32> to vector<64x1xf32>
    %133 = vector.broadcast %130 : f32 to vector<64x1xf32>
    %134 = arith.mulf %133, %132 : vector<64x1xf32>
    %135 = arith.addf %123, %134 : vector<64x1xf32>
    %c0_152 = arith.constant 0 : index
    %c2_153 = arith.constant 2 : index
    %c2_154 = arith.constant 2 : index
    %136 = memref.load %arg0[%c0_152, %c2_153, %c2_154] : memref<2x4x3xf32, #tpu.memory_space<smem>>
    %c2_155 = arith.constant 2 : index
    %c2_156 = arith.constant 2 : index
    %c0_157 = arith.constant 0 : index
    %c0_158 = arith.constant 0 : index
    %137 = vector.load %arg1[%c2_155, %c2_156, %c0_157, %c0_158] : memref<4x3x64x64xf32, #tpu.memory_space<vmem>>, vector<1x1x64x64xf32>
    %138 = vector.shape_cast %137 : vector<1x1x64x64xf32> to vector<64x64xf32>
    %139 = vector.broadcast %136 : f32 to vector<64x64xf32>
    %140 = arith.mulf %139, %138 : vector<64x64xf32>
    %141 = arith.addf %129, %140 : vector<64x64xf32>
    %c1_159 = arith.constant 1 : index
    %c2_160 = arith.constant 2 : index
    %c2_161 = arith.constant 2 : index
    %142 = memref.load %arg0[%c1_159, %c2_160, %c2_161] : memref<2x4x3xf32, #tpu.memory_space<smem>>
    %c2_162 = arith.constant 2 : index
    %c2_163 = arith.constant 2 : index
    %c0_164 = arith.constant 0 : index
    %c0_165 = arith.constant 0 : index
    %143 = vector.load %arg3[%c2_162, %c2_163, %c0_164, %c0_165] : memref<4x5x64x1xf32, #tpu.memory_space<vmem>>, vector<1x1x64x1xf32>
    %144 = vector.shape_cast %143 : vector<1x1x64x1xf32> to vector<64x1xf32>
    %145 = vector.broadcast %142 : f32 to vector<64x1xf32>
    %146 = arith.mulf %145, %144 : vector<64x1xf32>
    %147 = arith.addf %135, %146 : vector<64x1xf32>
    %148 = math.tanh %141 : vector<64x64xf32>
    %c0_166 = arith.constant 0 : index
    %c2_167 = arith.constant 2 : index
    %c0_168 = arith.constant 0 : index
    %c0_169 = arith.constant 0 : index
    %149 = vector.load %arg2[%c0_166, %c2_167, %c0_168, %c0_169] : memref<2x4x64x64xf32, #tpu.memory_space<vmem>>, vector<1x1x64x64xf32>
    %150 = vector.shape_cast %149 : vector<1x1x64x64xf32> to vector<64x64xf32>
    %151 = arith.mulf %148, %150 : vector<64x64xf32>
    %c1_170 = arith.constant 1 : index
    %c2_171 = arith.constant 2 : index
    %c0_172 = arith.constant 0 : index
    %c0_173 = arith.constant 0 : index
    %152 = vector.load %arg2[%c1_170, %c2_171, %c0_172, %c0_173] : memref<2x4x64x64xf32, #tpu.memory_space<vmem>>, vector<1x1x64x64xf32>
    %153 = vector.shape_cast %152 : vector<1x1x64x64xf32> to vector<64x64xf32>
    %154 = arith.addf %151, %153 : vector<64x64xf32>
    %155 = math.tanh %147 : vector<64x1xf32>
    %c2_174 = arith.constant 2 : index
    %c3_175 = arith.constant 3 : index
    %c0_176 = arith.constant 0 : index
    %c0_177 = arith.constant 0 : index
    %156 = vector.load %arg3[%c2_174, %c3_175, %c0_176, %c0_177] : memref<4x5x64x1xf32, #tpu.memory_space<vmem>>, vector<1x1x64x1xf32>
    %157 = vector.shape_cast %156 : vector<1x1x64x1xf32> to vector<64x1xf32>
    %158 = arith.mulf %155, %157 : vector<64x1xf32>
    %c2_178 = arith.constant 2 : index
    %c4_179 = arith.constant 4 : index
    %c0_180 = arith.constant 0 : index
    %c0_181 = arith.constant 0 : index
    %159 = vector.load %arg3[%c2_178, %c4_179, %c0_180, %c0_181] : memref<4x5x64x1xf32, #tpu.memory_space<vmem>>, vector<1x1x64x1xf32>
    %160 = vector.shape_cast %159 : vector<1x1x64x1xf32> to vector<64x1xf32>
    %161 = arith.addf %158, %160 : vector<64x1xf32>
    %162 = arith.truncf %154 : vector<64x64xf32> to vector<64x64xbf16>
    %c2_182 = arith.constant 2 : index
    %c0_183 = arith.constant 0 : index
    %c0_184 = arith.constant 0 : index
    %163 = vector.load %arg4[%c2_182, %c0_183, %c0_184] : memref<4x64x64xbf16, #tpu.memory_space<vmem>>, vector<1x64x64xbf16>
    %164 = vector.shape_cast %163 : vector<1x64x64xbf16> to vector<64x64xbf16>
    %165 = vector.shape_cast %162 : vector<64x64xbf16> to vector<1x64x64xbf16>
    tpu.vector_store %arg4[%c2_182, %c0_183, %c0_184], %165 {strides = array<i32>} : memref<4x64x64xbf16, #tpu.memory_space<vmem>>, vector<1x64x64xbf16>,
    %c2_185 = arith.constant 2 : index
    %c0_186 = arith.constant 0 : index
    %c0_187 = arith.constant 0 : index
    %166 = vector.load %arg5[%c2_185, %c0_186, %c0_187] : memref<4x64x1xf32, #tpu.memory_space<vmem>>, vector<1x64x1xf32>
    %167 = vector.shape_cast %166 : vector<1x64x1xf32> to vector<64x1xf32>
    %168 = vector.shape_cast %161 : vector<64x1xf32> to vector<1x64x1xf32>
    tpu.vector_store %arg5[%c2_185, %c0_186, %c0_187], %168 {strides = array<i32>} : memref<4x64x1xf32, #tpu.memory_space<vmem>>, vector<1x64x1xf32>,
    %c0_188 = arith.constant 0 : index
    %c3_189 = arith.constant 3 : index
    %c0_190 = arith.constant 0 : index
    %169 = memref.load %arg0[%c0_188, %c3_189, %c0_190] : memref<2x4x3xf32, #tpu.memory_space<smem>>
    %c3_191 = arith.constant 3 : index
    %c0_192 = arith.constant 0 : index
    %c0_193 = arith.constant 0 : index
    %c0_194 = arith.constant 0 : index
    %170 = vector.load %arg1[%c3_191, %c0_192, %c0_193, %c0_194] : memref<4x3x64x64xf32, #tpu.memory_space<vmem>>, vector<1x1x64x64xf32>
    %171 = vector.shape_cast %170 : vector<1x1x64x64xf32> to vector<64x64xf32>
    %172 = vector.broadcast %169 : f32 to vector<64x64xf32>
    %173 = arith.mulf %172, %171 : vector<64x64xf32>
    %c1_195 = arith.constant 1 : index
    %c3_196 = arith.constant 3 : index
    %c0_197 = arith.constant 0 : index
    %174 = memref.load %arg0[%c1_195, %c3_196, %c0_197] : memref<2x4x3xf32, #tpu.memory_space<smem>>
    %c3_198 = arith.constant 3 : index
    %c0_199 = arith.constant 0 : index
    %c0_200 = arith.constant 0 : index
    %c0_201 = arith.constant 0 : index
    %175 = vector.load %arg3[%c3_198, %c0_199, %c0_200, %c0_201] : memref<4x5x64x1xf32, #tpu.memory_space<vmem>>, vector<1x1x64x1xf32>
    %176 = vector.shape_cast %175 : vector<1x1x64x1xf32> to vector<64x1xf32>
    %177 = vector.broadcast %174 : f32 to vector<64x1xf32>
    %178 = arith.mulf %177, %176 : vector<64x1xf32>
    %c0_202 = arith.constant 0 : index
    %c3_203 = arith.constant 3 : index
    %c1_204 = arith.constant 1 : index
    %179 = memref.load %arg0[%c0_202, %c3_203, %c1_204] : memref<2x4x3xf32, #tpu.memory_space<smem>>
    %c3_205 = arith.constant 3 : index
    %c1_206 = arith.constant 1 : index
    %c0_207 = arith.constant 0 : index
    %c0_208 = arith.constant 0 : index
    %180 = vector.load %arg1[%c3_205, %c1_206, %c0_207, %c0_208] : memref<4x3x64x64xf32, #tpu.memory_space<vmem>>, vector<1x1x64x64xf32>
    %181 = vector.shape_cast %180 : vector<1x1x64x64xf32> to vector<64x64xf32>
    %182 = vector.broadcast %179 : f32 to vector<64x64xf32>
    %183 = arith.mulf %182, %181 : vector<64x64xf32>
    %184 = arith.addf %173, %183 : vector<64x64xf32>
    %c1_209 = arith.constant 1 : index
    %c3_210 = arith.constant 3 : index
    %c1_211 = arith.constant 1 : index
    %185 = memref.load %arg0[%c1_209, %c3_210, %c1_211] : memref<2x4x3xf32, #tpu.memory_space<smem>>
    %c3_212 = arith.constant 3 : index
    %c1_213 = arith.constant 1 : index
    %c0_214 = arith.constant 0 : index
    %c0_215 = arith.constant 0 : index
    %186 = vector.load %arg3[%c3_212, %c1_213, %c0_214, %c0_215] : memref<4x5x64x1xf32, #tpu.memory_space<vmem>>, vector<1x1x64x1xf32>
    %187 = vector.shape_cast %186 : vector<1x1x64x1xf32> to vector<64x1xf32>
    %188 = vector.broadcast %185 : f32 to vector<64x1xf32>
    %189 = arith.mulf %188, %187 : vector<64x1xf32>
    %190 = arith.addf %178, %189 : vector<64x1xf32>
    %c0_216 = arith.constant 0 : index
    %c3_217 = arith.constant 3 : index
    %c2_218 = arith.constant 2 : index
    %191 = memref.load %arg0[%c0_216, %c3_217, %c2_218] : memref<2x4x3xf32, #tpu.memory_space<smem>>
    %c3_219 = arith.constant 3 : index
    %c2_220 = arith.constant 2 : index
    %c0_221 = arith.constant 0 : index
    %c0_222 = arith.constant 0 : index
    %192 = vector.load %arg1[%c3_219, %c2_220, %c0_221, %c0_222] : memref<4x3x64x64xf32, #tpu.memory_space<vmem>>, vector<1x1x64x64xf32>
    %193 = vector.shape_cast %192 : vector<1x1x64x64xf32> to vector<64x64xf32>
    %194 = vector.broadcast %191 : f32 to vector<64x64xf32>
    %195 = arith.mulf %194, %193 : vector<64x64xf32>
    %196 = arith.addf %184, %195 : vector<64x64xf32>
    %c1_223 = arith.constant 1 : index
    %c3_224 = arith.constant 3 : index
    %c2_225 = arith.constant 2 : index
    %197 = memref.load %arg0[%c1_223, %c3_224, %c2_225] : memref<2x4x3xf32, #tpu.memory_space<smem>>
    %c3_226 = arith.constant 3 : index
    %c2_227 = arith.constant 2 : index
    %c0_228 = arith.constant 0 : index
    %c0_229 = arith.constant 0 : index
    %198 = vector.load %arg3[%c3_226, %c2_227, %c0_228, %c0_229] : memref<4x5x64x1xf32, #tpu.memory_space<vmem>>, vector<1x1x64x1xf32>
    %199 = vector.shape_cast %198 : vector<1x1x64x1xf32> to vector<64x1xf32>
    %200 = vector.broadcast %197 : f32 to vector<64x1xf32>
    %201 = arith.mulf %200, %199 : vector<64x1xf32>
    %202 = arith.addf %190, %201 : vector<64x1xf32>
    %203 = math.tanh %196 : vector<64x64xf32>
    %c0_230 = arith.constant 0 : index
    %c3_231 = arith.constant 3 : index
    %c0_232 = arith.constant 0 : index
    %c0_233 = arith.constant 0 : index
    %204 = vector.load %arg2[%c0_230, %c3_231, %c0_232, %c0_233] : memref<2x4x64x64xf32, #tpu.memory_space<vmem>>, vector<1x1x64x64xf32>
    %205 = vector.shape_cast %204 : vector<1x1x64x64xf32> to vector<64x64xf32>
    %206 = arith.mulf %203, %205 : vector<64x64xf32>
    %c1_234 = arith.constant 1 : index
    %c3_235 = arith.constant 3 : index
    %c0_236 = arith.constant 0 : index
    %c0_237 = arith.constant 0 : index
    %207 = vector.load %arg2[%c1_234, %c3_235, %c0_236, %c0_237] : memref<2x4x64x64xf32, #tpu.memory_space<vmem>>, vector<1x1x64x64xf32>
    %208 = vector.shape_cast %207 : vector<1x1x64x64xf32> to vector<64x64xf32>
    %209 = arith.addf %206, %208 : vector<64x64xf32>
    %210 = math.tanh %202 : vector<64x1xf32>
    %c3_238 = arith.constant 3 : index
    %c3_239 = arith.constant 3 : index
    %c0_240 = arith.constant 0 : index
    %c0_241 = arith.constant 0 : index
    %211 = vector.load %arg3[%c3_238, %c3_239, %c0_240, %c0_241] : memref<4x5x64x1xf32, #tpu.memory_space<vmem>>, vector<1x1x64x1xf32>
    %212 = vector.shape_cast %211 : vector<1x1x64x1xf32> to vector<64x1xf32>
    %213 = arith.mulf %210, %212 : vector<64x1xf32>
    %c3_242 = arith.constant 3 : index
    %c4_243 = arith.constant 4 : index
    %c0_244 = arith.constant 0 : index
    %c0_245 = arith.constant 0 : index
    %214 = vector.load %arg3[%c3_242, %c4_243, %c0_244, %c0_245] : memref<4x5x64x1xf32, #tpu.memory_space<vmem>>, vector<1x1x64x1xf32>
    %215 = vector.shape_cast %214 : vector<1x1x64x1xf32> to vector<64x1xf32>
    %216 = arith.addf %213, %215 : vector<64x1xf32>
    %217 = arith.truncf %209 : vector<64x64xf32> to vector<64x64xbf16>
    %c3_246 = arith.constant 3 : index
    %c0_247 = arith.constant 0 : index
    %c0_248 = arith.constant 0 : index
    %218 = vector.load %arg4[%c3_246, %c0_247, %c0_248] : memref<4x64x64xbf16, #tpu.memory_space<vmem>>, vector<1x64x64xbf16>
    %219 = vector.shape_cast %218 : vector<1x64x64xbf16> to vector<64x64xbf16>
    %220 = vector.shape_cast %217 : vector<64x64xbf16> to vector<1x64x64xbf16>
    tpu.vector_store %arg4[%c3_246, %c0_247, %c0_248], %220 {strides = array<i32>} : memref<4x64x64xbf16, #tpu.memory_space<vmem>>, vector<1x64x64xbf16>,
    %c3_249 = arith.constant 3 : index
    %c0_250 = arith.constant 0 : index
    %c0_251 = arith.constant 0 : index
    %221 = vector.load %arg5[%c3_249, %c0_250, %c0_251] : memref<4x64x1xf32, #tpu.memory_space<vmem>>, vector<1x64x1xf32>
    %222 = vector.shape_cast %221 : vector<1x64x1xf32> to vector<64x1xf32>
    %223 = vector.shape_cast %216 : vector<64x1xf32> to vector<1x64x1xf32>
    tpu.vector_store %arg5[%c3_249, %c0_250, %c0_251], %223 {strides = array<i32>} : memref<4x64x1xf32, #tpu.memory_space<vmem>>, vector<1x64x1xf32>,
    return
  }
}

</mosaic_0001>

<bundles_post_ra>
// kernel: tpu_custom_call.1
= control target key start
LH: loop header
LB: loop body
LE: loop exit
PB: predicated region body
PF: predicated region fallthrough
CT: control target
= control target key end

     0   :  { %11 = vsyncpa [#allocation4], 0  ;;  %s3221_s0 = inlined_call_operand.vmem [shape: f32[2,4,3], index: 0, kind: input, shape index: {}]   ;;  %s3222_s1 = inlined_call_operand.vmem [shape: f32[4,3,64,64], index: 1, kind: input, shape index: {}]   ;;  %s3223_s2 = inlined_call_operand.vmem [shape: f32[2,4,64,64], index: 2, kind: input, shape index: {}]   ;;  %s3224_s3 = inlined_call_operand.vmem [shape: f32[4,5,64,1], index: 3, kind: input, shape index: {}]   ;;  %s3225_s4 = inlined_call_operand.hbm [shape: bf16[4,64,64], index: 4, kind: output, shape index: {0}]   ;;  %s3226_s5 = inlined_call_operand.vmem [shape: f32[4,64,1], index: 5, kind: output, shape index: {1}]  }
   0x1   :  { %12 = vsyncpa [#allocation3], 0  ;;  %s18_s20 = sshll.u32 %s3221_s0, 4  ;;  %s19_s20 = int_to_ptr.vmem [resolvable:$true] %s18_s20 }
   0x2   :  { %s1728_s21 = scalar_lea.vmem %s19_s20, 128  ;;  %p1733_p1 = scmp.lt.s32.totalorder %s19_s20, %s19_s20 }
   0x3   :  { %p1729_p0 = scmp.ne.s32.totalorder %s19_s20, %s1728_s21  ;;  %p1734_p2 = scmp.lt.s32.totalorder %s1728_s21, %s1728_s21 }
   0x5   :  { %p1735_p3 = por %p1734_p2, %p1733_p1 }
   0x7   :  { %p1736_p4 = pnand %p1735_p3, %p1729_p0 }
   0x9   :  { %1739 = shalt.err (!%p1736_p4)
}
   0xa   :  { %s1766_s22 = smov [#allocation2]   ;;  %s1767_s23 = smov 64  }
   0xb   :  { %s1768_s24 = smov 4  }
   0xc   :  { %24 = dma.vmem_to_smem %s19_s20, 128, %s1766_s22, [#allocation4], %s1767_s23, %s1767_s23, %s1768_s24  }
   0xd   :  { %1762 = dma.done.wait [#allocation4], 128  }
   0xe   :  { %1763 = vsyncadd [#allocation4], 4294967168 }
   0xf   :  { %34 = sfence }
  0x10   :  { %s35_s25 = sld [smem:[#allocation2]]  ;;  %s1190_s0 = sld [smem:[#allocation2 + $0x1]]  ;;  %v36_v0 = vld [vmem:[%s3222_s1] sm:$0xff]  ;;  %v37_v3 = vld [vmem:[%s3222_s1 + $0x8] sm:$0xff]  ;;  %v38_v6 = vld [vmem:[%s3222_s1 + $0x10] sm:$0xff]  ;;  %vm310_vm0 = vcmask 519168  }
  0x11   :  { %s1208_s26 = sld [smem:[#allocation2 + $0x2]]  ;;  %v1191_v1 = vld [vmem:[%s3222_s1 + $0x40] sm:$0xff]  ;;  %v1192_v4 = vld [vmem:[%s3222_s1 + $0x48] sm:$0xff]  ;;  %v1193_v7 = vld [vmem:[%s3222_s1 + $0x50] sm:$0xff]  ;;  %s1857_s12 = sld [smem:[#allocation2 + $0x80]]  ;;  %vm319_vm1 = vcmask 7168  }
  0x12   :  { %v1209_v2 = vld [vmem:[%s3222_s1 + $0x80] sm:$0xff]  ;;  %v1210_v5 = vld [vmem:[%s3222_s1 + $0x88] sm:$0xff]  ;;  %v1211_v10 = vld [vmem:[%s3222_s1 + $0x90] sm:$0xff]  ;;  %s1862_s15 = sld [smem:[#allocation2 + $0x81]]  ;;  %s1867_s18 = sld [smem:[#allocation2 + $0x82]] }
  0x13   :  { %v39_v11 = vld [vmem:[%s3222_s1 + $0x18] sm:$0xff]  ;;  %v40_v18 = vld [vmem:[%s3222_s1 + $0x20] sm:$0xff]  ;;  %v41_v29 = vld [vmem:[%s3222_s1 + $0x28] sm:$0xff]  ;;  %s2029_s11 = sld [smem:[#allocation2 + $0x100]]  ;;  %s2037_s16 = sld [smem:[#allocation2 + $0x101]] }
  0x14   :  { %v1194_v16 = vld [vmem:[%s3222_s1 + $0x58] sm:$0xff]  ;;  %v1195_v23 = vld [vmem:[%s3222_s1 + $0x60] sm:$0xff]  ;;  %v1196_v30 = vld [vmem:[%s3222_s1 + $0x68] sm:$0xff]  ;;  %s2050_s27 = sld [smem:[#allocation2 + $0x102]]  ;;  %s2164_s30 = sld [smem:[#allocation2 + $0x180]] }
  0x15   :  { %v1212_v17 = vld [vmem:[%s3222_s1 + $0x98] sm:$0xff]  ;;  %v1213_v24 = vld [vmem:[%s3222_s1 + $0xa0] sm:$0xff]  ;;  %v1214_v35 = vld [vmem:[%s3222_s1 + $0xa8] sm:$0xff]  ;;  %s2182_s13 = sld [smem:[#allocation2 + $0x181]]  ;;  %s2184_s14 = sld [smem:[#allocation2 + $0x182]] }
  0x16   :  { %v44_v8 = vstv %s35_s25  ;;  %v81_v9 = vstv %s1190_s0  ;;  %v42_v40 = vld [vmem:[%s3222_s1 + $0x30] sm:$0xff]  ;;  %v43_v50 = vld [vmem:[%s3222_s1 + $0x38] sm:$0xff]  ;;  %s2332_s21 = sld [smem:[#allocation2 + $0x200]]  ;;  %s2363_s8 = sld [smem:[#allocation2 + $0x202]] }
  0x17   :  { %v45_v12 = vmul.f32 %v44_v8, %v36_v0  ;;  %v82_v13 = vmul.f32 %v1191_v1, %v81_v9  ;;  %v135_v14 = vstv %s1208_s26  ;;  %v46_v15 = vmul.f32 %v44_v8, %v37_v3  ;;  %v1197_v45 = vld [vmem:[%s3222_s1 + $0x70] sm:$0xff]  ;;  %v1198_v51 = vld [vmem:[%s3222_s1 + $0x78] sm:$0xff]  ;;  %v1259_v59 = vld [vmem:[%s3222_s1 + $0xc0] sm:$0xff]  ;;  %s2503_s6 = sld [smem:[#allocation2 + $0x281]]  ;;  %s2520_s19 = sld [smem:[#allocation2 + $0x282]] }
  0x18   :  { %v136_v19 = vmul.f32 %v1209_v2, %v135_v14  ;;  %v83_v20 = vmul.f32 %v1192_v4, %v81_v9  ;;  %v137_v21 = vmul.f32 %v1210_v5, %v135_v14  ;;  %v47_v22 = vmul.f32 %v44_v8, %v38_v6  ;;  %v1215_v46 = vld [vmem:[%s3222_s1 + $0xb0] sm:$0xff]  ;;  %v1216_v55 = vld [vmem:[%s3222_s1 + $0xb8] sm:$0xff]  ;;  %v1277_v63 = vld [vmem:[%s3222_s1 + $0x100] sm:$0xff]  ;;  %s2680_s28 = sld [smem:[#allocation2 + $0x300]]  ;;  %s2711_s10 = sld [smem:[#allocation2 + $0x302]] }
  0x19   :  { %v90_v25 = vadd.f32 %v82_v13, %v45_v12  ;;  %v84_v26 = vmul.f32 %v1193_v7, %v81_v9  ;;  %v138_v27 = vmul.f32 %v1211_v10, %v135_v14  ;;  %v48_v28 = vmul.f32 %v44_v8, %v39_v11  ;;  %v1260_v0 = vld [vmem:[%s3222_s1 + $0xc8] sm:$0xff]  ;;  %v1295_v4 = vld [vmem:[%s3222_s1 + $0x140] sm:$0xff]  ;;  %v1261_v10 = vld [vmem:[%s3222_s1 + $0xd0] sm:$0xff] }
  0x1a   :  { %v91_v31 = vadd.f32 %v83_v20, %v46_v15  ;;  %v85_v32 = vmul.f32 %v1194_v16, %v81_v9  ;;  %v139_v33 = vmul.f32 %v1212_v17, %v135_v14  ;;  %v49_v34 = vmul.f32 %v44_v8, %v40_v18  ;;  %v1278_v5 = vld [vmem:[%s3222_s1 + $0x108] sm:$0xff]  ;;  %v1279_v11 = vld [vmem:[%s3222_s1 + $0x110] sm:$0xff]  ;;  %v1262_v17 = vld [vmem:[%s3222_s1 + $0xd8] sm:$0xff] }
  0x1b   :  { %v144_v36 = vadd.f32 %v136_v19, %v90_v25  ;;  %v92_v37 = vadd.f32 %v84_v26, %v47_v22  ;;  %v86_v38 = vmul.f32 %v1195_v23, %v81_v9  ;;  %v140_v39 = vmul.f32 %v1213_v24, %v135_v14  ;;  %v1296_v6 = vld [vmem:[%s3222_s1 + $0x148] sm:$0xff]  ;;  %v1297_v16 = vld [vmem:[%s3222_s1 + $0x150] sm:$0xff]  ;;  %v1280_v22 = vld [vmem:[%s3222_s1 + $0x118] sm:$0xff] }
  0x1c   :  { %v145_v41 = vadd.f32 %v137_v21, %v91_v31  ;;  %v93_v42 = vadd.f32 %v85_v32, %v48_v28  ;;  %v50_v43 = vmul.f32 %v44_v8, %v41_v29  ;;  %v87_v44 = vmul.f32 %v1196_v30, %v81_v9  ;;  %v1298_v23 = vld [vmem:[%s3222_s1 + $0x158] sm:$0xff]  ;;  %v187_v24 = vld [vmem:[%s3223_s2] sm:$0xff]  ;;  %v188_v30 = vld [vmem:[%s3223_s2 + $0x8] sm:$0xff] }
  0x1d   :  { %1600 = vtanh.f32 %v144_v36  ;;  %v146_v47 = vadd.f32 %v138_v27, %v92_v37  ;;  %v94_v48 = vadd.f32 %v86_v38, %v49_v34  ;;  %v141_v49 = vmul.f32 %v1214_v35, %v135_v14  ;;  %v1263_v28 = vld [vmem:[%s3222_s1 + $0xe0] sm:$0xff]  ;;  %v189_v36 = vld [vmem:[%s3223_s2 + $0x10] sm:$0xff] }
  0x1e   :  { %1602 = vtanh.f32 %v145_v41  ;;  %v147_v52 = vadd.f32 %v139_v33, %v93_v42  ;;  %v95_v53 = vadd.f32 %v87_v44, %v50_v43  ;;  %v51_v54 = vmul.f32 %v44_v8, %v42_v40  ;;  %v1281_v29 = vld [vmem:[%s3222_s1 + $0x120] sm:$0xff]  ;;  %v1227_v43 = vld [vmem:[%s3223_s2 + $0x108] sm:$0xff]  ;;  %v190_v44 = vld [vmem:[%s3223_s2 + $0x18] sm:$0xff] }
  0x1f   :  { %1604 = vtanh.f32 %v146_v47  ;;  %v148_v56 = vadd.f32 %v140_v39, %v94_v48  ;;  %v88_v57 = vmul.f32 %v1197_v45, %v81_v9  ;;  %v142_v58 = vmul.f32 %v1215_v46, %v135_v14  ;;  %v1226_v35 = vld [vmem:[%s3223_s2 + $0x100] sm:$0xff] }
  0x20   :  { %1606 = vtanh.f32 %v147_v52  ;;  %v149_v60 = vadd.f32 %v141_v49, %v95_v53  ;;  %v52_v61 = vmul.f32 %v44_v8, %v43_v50  ;;  %v89_v62 = vmul.f32 %v1198_v51, %v81_v9  ;;  %v1228_v50 = vld [vmem:[%s3223_s2 + $0x110] sm:$0xff]  ;;  %v191_v51 = vld [vmem:[%s3223_s2 + $0x20] sm:$0xff] }
  0x21   :  { %1608 = vtanh.f32 %v148_v56  ;;  %v96_v1 = vadd.f32 %v88_v57, %v51_v54  ;;  %v143_v2 = vmul.f32 %v1216_v55, %v135_v14  ;;  %v1894_v3 = vstv %s1857_s12  ;;  %v1299_v54 = vld [vmem:[%s3222_s1 + $0x160] sm:$0xff] }
  0x22   :  { %1610 = vtanh.f32 %v149_v60  ;;  %v97_v7 = vadd.f32 %v89_v62, %v52_v61  ;;  %v339_v8 = vmul.f32 %v1259_v59, %v1894_v3  ;;  %v1907_v9 = vstv %s1862_s15  ;;  %v192_v59 = vld [vmem:[%s3223_s2 + $0x28] sm:$0xff] }
  0x23   :  { %v150_v12 = vadd.f32 %v142_v58, %v96_v1  ;;  %v377_v13 = vmul.f32 %v1277_v63, %v1907_v9  ;;  %v1917_v14 = vstv %s1867_s18  ;;  %v340_v15 = vmul.f32 %v1260_v0, %v1894_v3  ;;  %v1229_v58 = vld [vmem:[%s3223_s2 + $0x118] sm:$0xff]  ;;  %v1230_v0 = vld [vmem:[%s3223_s2 + $0x120] sm:$0xff] }
  0x24   :  { %v151_v18 = vadd.f32 %v143_v2, %v97_v7  ;;  %v431_v19 = vmul.f32 %v1295_v4, %v1917_v14  ;;  %v378_v20 = vmul.f32 %v1278_v5, %v1907_v9  ;;  %v432_v21 = vmul.f32 %v1296_v6, %v1917_v14  ;;  %v1231_v7 = vld [vmem:[%s3223_s2 + $0x128] sm:$0xff] }
  0x25   :  { %1612 = vtanh.f32 %v150_v12  ;;  %v385_v25 = vadd.f32 %v377_v13, %v339_v8  ;;  %v341_v26 = vmul.f32 %v1261_v10, %v1894_v3  ;;  %v379_v27 = vmul.f32 %v1279_v11, %v1907_v9  ;;  %v1264_v10 = vld [vmem:[%s3222_s1 + $0xe8] sm:$0xff] }
  0x26   :  { %1614 = vtanh.f32 %v151_v18  ;;  %v386_v31 = vadd.f32 %v378_v20, %v340_v15  ;;  %v433_v32 = vmul.f32 %v1297_v16, %v1917_v14  ;;  %v342_v33 = vmul.f32 %v1262_v17, %v1894_v3  ;;  %v193_v15 = vld [vmem:[%s3223_s2 + $0x30] sm:$0xff] }
  0x27   :  { %v1601_v34 = vpop.eup %1600  ;;  %v439_v37 = vadd.f32 %v431_v19, %v385_v25  ;;  %v387_v38 = vadd.f32 %v379_v27, %v341_v26  ;;  %v380_v39 = vmul.f32 %v1280_v22, %v1907_v9  ;;  %v434_v40 = vmul.f32 %v1298_v23, %v1917_v14  ;;  %v194_v19 = vld [vmem:[%s3223_s2 + $0x38] sm:$0xff]  ;;  %v1232_v26 = vld [vmem:[%s3223_s2 + $0x130] sm:$0xff] }
  0x28   :  { %v1603_v41 = vpop.eup %1602  ;;  %v195_v42 = vmul.f32 %v1601_v34, %v187_v24  ;;  %v440_v45 = vadd.f32 %v432_v21, %v386_v31  ;;  %v343_v46 = vmul.f32 %v1263_v28, %v1894_v3  ;;  %v381_v47 = vmul.f32 %v1281_v29, %v1907_v9  ;;  %v1282_v21 = vld [vmem:[%s3222_s1 + $0x128] sm:$0xff]  ;;  %v1265_v29 = vld [vmem:[%s3222_s1 + $0xf0] sm:$0xff]  ;;  %v1233_v34 = vld [vmem:[%s3223_s2 + $0x138] sm:$0xff] }
  0x29   :  { %v1605_v48 = vpop.eup %1604  ;;  %v196_v49 = vmul.f32 %v1603_v41, %v188_v30  ;;  %1616 = vtanh.f32 %v439_v37  ;;  %v441_v52 = vadd.f32 %v433_v32, %v387_v38  ;;  %v388_v53 = vadd.f32 %v380_v39, %v342_v33  ;;  %v1300_v28 = vld [vmem:[%s3222_s1 + $0x168] sm:$0xff]  ;;  %v1312_v39 = vld [vmem:[%s3223_s2 + $0x40] sm:$0xff]  ;;  %v1301_v41 = vld [vmem:[%s3222_s1 + $0x170] sm:$0xff] }
  0x2a   :  { %v1607_v55 = vpop.eup %1606  ;;  %v212_v56 = vadd.f32 %v1226_v35, %v195_v42  ;;  %v197_v57 = vmul.f32 %v1605_v48, %v189_v36  ;;  %1618 = vtanh.f32 %v440_v45  ;;  %v389_v60 = vadd.f32 %v381_v47, %v343_v46  ;;  %v1283_v35 = vld [vmem:[%s3222_s1 + $0x130] sm:$0xff]  ;;  %v1266_v42 = vld [vmem:[%s3222_s1 + $0xf8] sm:$0xff]  ;;  %v1313_v45 = vld [vmem:[%s3223_s2 + $0x48] sm:$0xff] }
  0x2b   :  { %v1609_v61 = vpop.eup %1608  ;;  %v213_v62 = vadd.f32 %v1227_v43, %v196_v49  ;;  %v198_v63 = vmul.f32 %v1607_v55, %v190_v44  ;;  %1620 = vtanh.f32 %v441_v52  ;;  %v442_v1 = vadd.f32 %v434_v40, %v388_v53  ;;  %v1314_v52 = vld [vmem:[%s3223_s2 + $0x50] sm:$0xff]  ;;  %v1284_v55 = vld [vmem:[%s3222_s1 + $0x138] sm:$0xff] }
  0x2c   :  { %v1611_v2 = vpop.eup %1610  ;;  %v262_v4 = vmul.f32 0.25, %v212_v56  ;;  %v214_v5 = vadd.f32 %v1228_v50, %v197_v57  ;;  %v199_v6 = vmul.f32 %v1609_v61, %v191_v51  ;;  %v435_v8 = vmul.f32 %v1299_v54, %v1917_v14  ;;  %v1320_v51 = vld [vmem:[%s3223_s2 + $0x140] sm:$0xff] }
  0x2d   :  { %v263_v11 = vmul.f32 0.25, %v213_v62  ;;  %v215_v12 = vadd.f32 %v1229_v58, %v198_v63  ;;  %v200_v13 = vmul.f32 %v1611_v2, %v192_v59  ;;  %1622 = vtanh.f32 %v442_v1  ;;  %v1321_v59 = vld [vmem:[%s3223_s2 + $0x148] sm:$0xff]  ;;  %v1322_v1 = vld [vmem:[%s3223_s2 + $0x150] sm:$0xff]  ;;  %v1315_v2 = vld [vmem:[%s3223_s2 + $0x58] sm:$0xff] }
  0x2e   :  { %v1564_v16 = vpack.c.bf16 %v262_v4, %v262_v4  ;;  %v264_v17 = vmul.f32 0.25, %v214_v5  ;;  %v216_v18 = vadd.f32 %v1230_v0, %v199_v6  ;;  %v443_v20 = vadd.f32 %v435_v8, %v389_v60 }
  0x2f   :  { %v1613_v22 = vpop.eup %1612  ;;  %v1565_v23 = vpack.c.bf16 %v263_v11, %v263_v11  ;;  %v265_v24 = vmul.f32 0.25, %v215_v12  ;;  %v217_v25 = vadd.f32 %v1231_v7, %v200_v13  ;;  %v344_v27 = vmul.f32 %v1264_v10, %v1894_v3  ;;  %v1302_v10 = vld [vmem:[%s3222_s1 + $0x178] sm:$0xff] }
  0x30   :  { %v1615_v30 = vpop.eup %1614  ;;  %311 = vst.msk [vmem:[#allocation5] sm:$0xf] %vm310_vm0, %v1564_v16  ;;  %v1566_v31 = vpack.c.bf16 %v264_v17, %v264_v17  ;;  %v266_v32 = vmul.f32 0.25, %v216_v18  ;;  %v201_v33 = vmul.f32 %v1613_v22, %v193_v15  ;;  %1624 = vtanh.f32 %v443_v20  ;;  %v1323_v15 = vld [vmem:[%s3223_s2 + $0x158] sm:$0xff]  ;;  %v1361_v17 = vld [vmem:[%s3222_s1 + $0x180] sm:$0xff] }
  0x31   :  { %312 = vst.msk [vmem:[#allocation5 + $0x4] sm:$0xf] %vm310_vm0, %v1565_v23  ;;  %v1567_v36 = vpack.c.bf16 %v265_v24, %v265_v24  ;;  %v267_v37 = vmul.f32 0.25, %v217_v25  ;;  %v202_v38 = vmul.f32 %v1615_v30, %v194_v19  ;;  %v382_v40 = vmul.f32 %v1282_v21, %v1907_v9  ;;  %v1316_v20 = vld [vmem:[%s3223_s2 + $0x60] sm:$0xff] }
  0x32   :  { %313 = vst.msk [vmem:[#allocation5 + $0x8] sm:$0xf] %vm310_vm0, %v1566_v31  ;;  %v1568_v43 = vpack.c.bf16 %v266_v32, %v266_v32  ;;  %v218_v44 = vadd.f32 %v1232_v26, %v201_v33  ;;  %v436_v46 = vmul.f32 %v1300_v28, %v1917_v14  ;;  %v345_v47 = vmul.f32 %v1265_v29, %v1894_v3  ;;  %v1379_v22 = vld [vmem:[%s3222_s1 + $0x1c0] sm:$0xff]  ;;  %v1380_v28 = vld [vmem:[%s3222_s1 + $0x1c8] sm:$0xff] }
  0x33   :  { %v1617_v48 = vpop.eup %1616  ;;  %314 = vst.msk [vmem:[#allocation5 + $0xc] sm:$0xf] %vm310_vm0, %v1567_v36  ;;  %v1569_v49 = vpack.c.bf16 %v267_v37, %v267_v37  ;;  %v219_v50 = vadd.f32 %v1233_v34, %v202_v38  ;;  %v390_v53 = vadd.f32 %v382_v40, %v344_v27  ;;  %v383_v54 = vmul.f32 %v1283_v35, %v1907_v9  ;;  %v1397_v26 = vld [vmem:[%s3222_s1 + $0x200] sm:$0xff]  ;;  %v1362_v27 = vld [vmem:[%s3222_s1 + $0x188] sm:$0xff]  ;;  %v1381_v40 = vld [vmem:[%s3222_s1 + $0x1d0] sm:$0xff] }
  0x34   :  { %v1619_v56 = vpop.eup %1618  ;;  %315 = vst.msk [vmem:[#allocation5 + $0x10] sm:$0xf] %vm310_vm0, %v1568_v43  ;;  %v268_v57 = vmul.f32 0.25, %v218_v44  ;;  %v491_v58 = vmul.f32 %v1617_v48, %v1312_v39  ;;  %v437_v60 = vmul.f32 %v1301_v41, %v1917_v14  ;;  %v346_v61 = vmul.f32 %v1266_v42, %v1894_v3  ;;  %v1324_v31 = vld [vmem:[%s3223_s2 + $0x160] sm:$0xff]  ;;  %v1398_v34 = vld [vmem:[%s3222_s1 + $0x208] sm:$0xff]  ;;  %v1363_v39 = vld [vmem:[%s3222_s1 + $0x190] sm:$0xff] }
  0x35   :  { %v1621_v62 = vpop.eup %1620  ;;  %316 = vst.msk [vmem:[#allocation5 + $0x14] sm:$0xf] %vm310_vm0, %v1569_v49  ;;  %v269_v63 = vmul.f32 0.25, %v219_v50  ;;  %v492_v0 = vmul.f32 %v1619_v56, %v1313_v45  ;;  %v444_v4 = vadd.f32 %v436_v46, %v390_v53  ;;  %v391_v5 = vadd.f32 %v383_v54, %v345_v47  ;;  %v1399_v41 = vld [vmem:[%s3222_s1 + $0x210] sm:$0xff]  ;;  %v1364_v46 = vld [vmem:[%s3222_s1 + $0x198] sm:$0xff] }
  0x36   :  { %v1570_v6 = vpack.c.bf16 %v268_v57, %v268_v57  ;;  %v508_v7 = vadd.f32 %v1320_v51, %v491_v58  ;;  %v493_v8 = vmul.f32 %v1621_v62, %v1314_v52  ;;  %v384_v3 = vmul.f32 %v1284_v55, %v1907_v9  ;;  %v1382_v47 = vld [vmem:[%s3222_s1 + $0x1d8] sm:$0xff]  ;;  %v1365_v52 = vld [vmem:[%s3222_s1 + $0x1a0] sm:$0xff] }
  0x37   :  { %v1623_v11 = vpop.eup %1622  ;;  %v1571_v12 = vpack.c.bf16 %v269_v63, %v269_v63  ;;  %v509_v13 = vadd.f32 %v1321_v59, %v492_v0  ;;  %1626 = vtanh.f32 %v444_v4  ;;  %v445_v16 = vadd.f32 %v437_v60, %v391_v5  ;;  %v1400_v51 = vld [vmem:[%s3222_s1 + $0x218] sm:$0xff]  ;;  %v1383_v57 = vld [vmem:[%s3222_s1 + $0x1e0] sm:$0xff]  ;;  %v1317_v60 = vld [vmem:[%s3223_s2 + $0x68] sm:$0xff] }
  0x38   :  { %317 = vst.msk [vmem:[#allocation5 + $0x18] sm:$0xf] %vm310_vm0, %v1570_v6  ;;  %v1572_v9 = vpack.c.bf16 %v508_v7, %v508_v7  ;;  %v510_v18 = vadd.f32 %v1322_v1, %v493_v8  ;;  %v494_v19 = vmul.f32 %v1623_v11, %v1315_v2  ;;  %v392_v21 = vadd.f32 %v384_v3, %v346_v61  ;;  %v1401_v58 = vld [vmem:[%s3222_s1 + $0x220] sm:$0xff]  ;;  %v1366_v0 = vld [vmem:[%s3222_s1 + $0x1a8] sm:$0xff] }
  0x39   :  { %318 = vst.msk [vmem:[#allocation5 + $0x1c] sm:$0xf] %vm310_vm0, %v1571_v12  ;;  %v1573_v23 = vpack.c.bf16 %v509_v13, %v509_v13  ;;  %1628 = vtanh.f32 %v445_v16  ;;  %v438_v24 = vmul.f32 %v1302_v10, %v1917_v14  ;;  %v2085_v25 = vstv %s2029_s11  ;;  %v1384_v6 = vld [vmem:[%s3222_s1 + $0x1e8] sm:$0xff]  ;;  %v1318_v10 = vld [vmem:[%s3223_s2 + $0x70] sm:$0xff] }
  0x3a   :  { %v1625_v29 = vpop.eup %1624  ;;  %591 = vst.msk [vmem:[#allocation5 + $0x20] sm:$0xf] %vm310_vm0, %v1572_v9  ;;  %v1574_v30 = vpack.c.bf16 %v510_v18, %v510_v18  ;;  %v511_v14 = vadd.f32 %v1323_v15, %v494_v19  ;;  %v619_v32 = vmul.f32 %v1361_v17, %v2085_v25  ;;  %v2102_v33 = vstv %s2037_s16  ;;  %v1402_v7 = vld [vmem:[%s3222_s1 + $0x228] sm:$0xff]  ;;  %v1367_v15 = vld [vmem:[%s3222_s1 + $0x1b0] sm:$0xff] }
  0x3b   :  { %592 = vst.msk [vmem:[#allocation5 + $0x24] sm:$0xf] %vm310_vm0, %v1573_v23  ;;  %v495_v35 = vmul.f32 %v1625_v29, %v1316_v20  ;;  %v446_v36 = vadd.f32 %v438_v24, %v392_v21  ;;  %v657_v37 = vmul.f32 %v1379_v22, %v2102_v33  ;;  %v2110_v38 = vstv %s2050_s27  ;;  %v1325_v3 = vld [vmem:[%s3223_s2 + $0x168] sm:$0xff]  ;;  %v1385_v18 = vld [vmem:[%s3222_s1 + $0x1f0] sm:$0xff] }
  0x3c   :  { %593 = vst.msk [vmem:[#allocation5 + $0x28] sm:$0xf] %vm310_vm0, %v1574_v30  ;;  %v1575_v42 = vpack.c.bf16 %v511_v14, %v511_v14  ;;  %v711_v43 = vmul.f32 %v1397_v26, %v2110_v38  ;;  %v620_v44 = vmul.f32 %v1362_v27, %v2085_v25  ;;  %v658_v45 = vmul.f32 %v1380_v28, %v2102_v33  ;;  %v1326_v20 = vld [vmem:[%s3223_s2 + $0x170] sm:$0xff]  ;;  %v1368_v27 = vld [vmem:[%s3222_s1 + $0x1b8] sm:$0xff] }
  0x3d   :  { %v512_v48 = vadd.f32 %v1324_v31, %v495_v35  ;;  %1630 = vtanh.f32 %v446_v36  ;;  %v665_v49 = vadd.f32 %v657_v37, %v619_v32  ;;  %v712_v50 = vmul.f32 %v1398_v34, %v2110_v38  ;;  %v1403_v26 = vld [vmem:[%s3222_s1 + $0x230] sm:$0xff]  ;;  %v1386_v14 = vld [vmem:[%s3222_s1 + $0x1f8] sm:$0xff] }
  0x3e   :  { %594 = vst.msk [vmem:[#allocation5 + $0x2c] sm:$0xf] %vm310_vm0, %v1575_v42  ;;  %v666_v53 = vadd.f32 %v658_v45, %v620_v44  ;;  %v621_v54 = vmul.f32 %v1363_v39, %v2085_v25  ;;  %v659_v55 = vmul.f32 %v1381_v40, %v2102_v33  ;;  %v713_v56 = vmul.f32 %v1399_v41, %v2110_v38  ;;  %v1319_v31 = vld [vmem:[%s3223_s2 + $0x78] sm:$0xff]  ;;  %v1463_v42 = vld [vmem:[%s3222_s1 + $0x240] sm:$0xff] }
  0x3f   :  { %v1576_v59 = vpack.c.bf16 %v512_v48, %v512_v48  ;;  %v719_v61 = vadd.f32 %v711_v43, %v665_v49  ;;  %v622_v62 = vmul.f32 %v1364_v46, %v2085_v25  ;;  %v660_v63 = vmul.f32 %v1382_v47, %v2102_v33  ;;  %v1404_v36 = vld [vmem:[%s3222_s1 + $0x238] sm:$0xff]  ;;  %v1464_v48 = vld [vmem:[%s3222_s1 + $0x248] sm:$0xff] }
  0x40   :  { %v720_v1 = vadd.f32 %v712_v50, %v666_v53  ;;  %v667_v2 = vadd.f32 %v659_v55, %v621_v54  ;;  %v714_v4 = vmul.f32 %v1400_v51, %v2110_v38  ;;  %v623_v5 = vmul.f32 %v1365_v52, %v2085_v25  ;;  %v1327_v44 = vld [vmem:[%s3223_s2 + $0x178] sm:$0xff]  ;;  %v1481_v52 = vld [vmem:[%s3222_s1 + $0x280] sm:$0xff] }
  0x41   :  { %v1627_v8 = vpop.eup %1626  ;;  %595 = vst.msk [vmem:[#allocation5 + $0x30] sm:$0xf] %vm310_vm0, %v1576_v59  ;;  %1632 = vtanh.f32 %v719_v61  ;;  %v668_v11 = vadd.f32 %v660_v63, %v622_v62  ;;  %v661_v12 = vmul.f32 %v1383_v57, %v2102_v33  ;;  %v715_v13 = vmul.f32 %v1401_v58, %v2110_v38  ;;  %v1414_v53 = vld [vmem:[%s3223_s2 + $0x80] sm:$0xff]  ;;  %v1500_v57 = vld [vmem:[%s3222_s1 + $0x2c8] sm:$0xff]  ;;  %v1465_v63 = vld [vmem:[%s3222_s1 + $0x250] sm:$0xff] }
  0x42   :  { %v496_v16 = vmul.f32 %v1627_v8, %v1317_v60  ;;  %1634 = vtanh.f32 %v720_v1  ;;  %v721_v17 = vadd.f32 %v713_v56, %v667_v2  ;;  %v624_v9 = vmul.f32 %v1366_v0, %v2085_v25  ;;  %v1415_v59 = vld [vmem:[%s3223_s2 + $0x88] sm:$0xff]  ;;  %v1422_v1 = vld [vmem:[%s3223_s2 + $0x180] sm:$0xff] }
  0x43   :  { %v1629_v19 = vpop.eup %1628  ;;  %v722_v21 = vadd.f32 %v714_v4, %v668_v11  ;;  %v669_v22 = vadd.f32 %v661_v12, %v623_v5  ;;  %v662_v23 = vmul.f32 %v1384_v6, %v2102_v33  ;;  %v716_v24 = vmul.f32 %v1402_v7, %v2110_v38  ;;  %v1483_v6 = vld [vmem:[%s3222_s1 + $0x290] sm:$0xff]  ;;  %v1423_v11 = vld [vmem:[%s3223_s2 + $0x188] sm:$0xff] }
  0x44   :  { %v513_v28 = vadd.f32 %v1325_v3, %v496_v16  ;;  %v497_v29 = vmul.f32 %v1629_v19, %v1318_v10  ;;  %1636 = vtanh.f32 %v721_v17  ;;  %v625_v30 = vmul.f32 %v1367_v15, %v2085_v25  ;;  %v1501_v7 = vld [vmem:[%s3222_s1 + $0x2d0] sm:$0xff]  ;;  %v1466_v16 = vld [vmem:[%s3222_s1 + $0x258] sm:$0xff] }
  0x45   :  { %1638 = vtanh.f32 %v722_v21  ;;  %v723_v32 = vadd.f32 %v715_v13, %v669_v22  ;;  %v670_v34 = vadd.f32 %v662_v23, %v624_v9  ;;  %v663_v35 = vmul.f32 %v1385_v18, %v2102_v33  ;;  %v1416_v12 = vld [vmem:[%s3223_s2 + $0x90] sm:$0xff]  ;;  %v1417_v9 = vld [vmem:[%s3223_s2 + $0x98] sm:$0xff] }
  0x46   :  { %v1577_v37 = vpack.c.bf16 %v513_v28, %v513_v28  ;;  %v514_v39 = vadd.f32 %v1326_v20, %v497_v29  ;;  %v717_v40 = vmul.f32 %v1403_v26, %v2110_v38  ;;  %v626_v41 = vmul.f32 %v1368_v27, %v2085_v25  ;;  %v1424_v22 = vld [vmem:[%s3223_s2 + $0x190] sm:$0xff]  ;;  %v1484_v27 = vld [vmem:[%s3222_s1 + $0x298] sm:$0xff] }
  0x47   :  { %v1631_v43 = vpop.eup %1630  ;;  %1640 = vtanh.f32 %v723_v32  ;;  %v724_v45 = vadd.f32 %v716_v24, %v670_v34  ;;  %v671_v46 = vadd.f32 %v663_v35, %v625_v30  ;;  %v664_v47 = vmul.f32 %v1386_v14, %v2102_v33  ;;  %v1499_v33 = vld [vmem:[%s3222_s1 + $0x2c0] sm:$0xff]  ;;  %v1425_v14 = vld [vmem:[%s3223_s2 + $0x198] sm:$0xff] }
  0x48   :  { %596 = vst.msk [vmem:[#allocation5 + $0x34] sm:$0xf] %vm310_vm0, %v1577_v37  ;;  %v1578_v25 = vpack.c.bf16 %v514_v39, %v514_v39  ;;  %v498_v49 = vmul.f32 %v1631_v43, %v1319_v31  ;;  %v718_v50 = vmul.f32 %v1404_v36, %v2110_v38  ;;  %v2223_v51 = vstv %s2164_s30  ;;  %v1482_v38 = vld [vmem:[%s3222_s1 + $0x288] sm:$0xff]  ;;  %v1418_v31 = vld [vmem:[%s3223_s2 + $0xa0] sm:$0xff] }
  0x49   :  { %1642 = vtanh.f32 %v724_v45  ;;  %v725_v54 = vadd.f32 %v717_v40, %v671_v46  ;;  %v672_v55 = vadd.f32 %v664_v47, %v626_v41  ;;  %v899_v56 = vmul.f32 %v1463_v42, %v2223_v51  ;;  %v1502_v40 = vld [vmem:[%s3222_s1 + $0x2d8] sm:$0xff]  ;;  %v1467_v41 = vld [vmem:[%s3222_s1 + $0x260] sm:$0xff]  ;;  %v1419_v46 = vld [vmem:[%s3223_s2 + $0xa8] sm:$0xff] }
  0x4a   :  { %597 = vst.msk [vmem:[#allocation5 + $0x38] sm:$0xf] %vm310_vm0, %v1578_v25  ;;  %v515_v58 = vadd.f32 %v1327_v44, %v498_v49  ;;  %v2246_v60 = vstv %s2182_s13  ;;  %v2249_v61 = vstv %s2184_s14  ;;  %v900_v62 = vmul.f32 %v1464_v48, %v2223_v51  ;;  %v1426_v45 = vld [vmem:[%s3223_s2 + $0x1a0] sm:$0xff]  ;;  %s2350_s14 = sld [smem:[#allocation2 + $0x201]] }
  0x4b   :  { %v1633_v0 = vpop.eup %1632  ;;  %1644 = vtanh.f32 %v725_v54  ;;  %v726_v2 = vadd.f32 %v718_v50, %v672_v55  ;;  %v937_v4 = vmul.f32 %v1481_v52, %v2246_v60  ;;  %v991_v5 = vmul.f32 %v1499_v33, %v2249_v61  ;;  %v1485_v50 = vld [vmem:[%s3222_s1 + $0x2a0] sm:$0xff]  ;;  %v1468_v33 = vld [vmem:[%s3222_s1 + $0x268] sm:$0xff] }
  0x4c   :  { %v1635_v8 = vpop.eup %1634  ;;  %v1579_v3 = vpack.c.bf16 %v515_v58, %v515_v58  ;;  %v771_v10 = vmul.f32 %v1633_v0, %v1414_v53  ;;  %v938_v13 = vmul.f32 %v1482_v38, %v2246_v60  ;;  %v992_v15 = vmul.f32 %v1500_v57, %v2249_v61  ;;  %v1503_v52 = vld [vmem:[%s3222_s1 + $0x2e0] sm:$0xff]  ;;  %v1427_v55 = vld [vmem:[%s3223_s2 + $0x1a8] sm:$0xff] }
  0x4d   :  { %v772_v17 = vmul.f32 %v1635_v8, %v1415_v59  ;;  %1646 = vtanh.f32 %v726_v2  ;;  %v945_v18 = vadd.f32 %v937_v4, %v899_v56  ;;  %v901_v19 = vmul.f32 %v1465_v63, %v2223_v51  ;;  %v1420_v56 = vld [vmem:[%s3223_s2 + $0xb0] sm:$0xff]  ;;  %v1486_v59 = vld [vmem:[%s3222_s1 + $0x2a8] sm:$0xff] }
  0x4e   :  { %v1637_v20 = vpop.eup %1636  ;;  %598 = vst.msk [vmem:[#allocation5 + $0x3c] sm:$0xf] %vm310_vm0, %v1579_v3  ;;  %v788_v21 = vadd.f32 %v1422_v1, %v771_v10  ;;  %v946_v23 = vadd.f32 %v938_v13, %v900_v62  ;;  %v939_v24 = vmul.f32 %v1483_v6, %v2246_v60  ;;  %v993_v26 = vmul.f32 %v1501_v7, %v2249_v61  ;;  %v1504_v1 = vld [vmem:[%s3222_s1 + $0x2e8] sm:$0xff]  ;;  %v1469_v2 = vld [vmem:[%s3222_s1 + $0x270] sm:$0xff]  ;;  %v1421_v6 = vld [vmem:[%s3223_s2 + $0xb8] sm:$0xff] }
  0x4f   :  { %v1639_v28 = vpop.eup %1638  ;;  %v789_v29 = vadd.f32 %v1423_v11, %v772_v17  ;;  %v773_v30 = vmul.f32 %v1637_v20, %v1416_v12  ;;  %v999_v32 = vadd.f32 %v991_v5, %v945_v18  ;;  %v902_v34 = vmul.f32 %v1466_v16, %v2223_v51  ;;  %v1428_v5 = vld [vmem:[%s3223_s2 + $0x1b0] sm:$0xff] }
  0x50   :  { %v1580_v35 = vpack.c.bf16 %v788_v21, %v788_v21  ;;  %v774_v36 = vmul.f32 %v1639_v28, %v1417_v9  ;;  %v1000_v37 = vadd.f32 %v992_v15, %v946_v23  ;;  %v947_v39 = vadd.f32 %v939_v24, %v901_v19  ;;  %v1487_v16 = vld [vmem:[%s3222_s1 + $0x2b0] sm:$0xff]  ;;  %v1470_v9 = vld [vmem:[%s3222_s1 + $0x278] sm:$0xff] }
  0x51   :  { %v1641_v42 = vpop.eup %1640  ;;  %v1581_v43 = vpack.c.bf16 %v789_v29, %v789_v29  ;;  %v790_v44 = vadd.f32 %v1424_v22, %v773_v30  ;;  %1648 = vtanh.f32 %v999_v32  ;;  %v940_v47 = vmul.f32 %v1484_v27, %v2246_v60  ;;  %v1505_v17 = vld [vmem:[%s3222_s1 + $0x2f0] sm:$0xff]  ;;  %v1429_v19 = vld [vmem:[%s3223_s2 + $0x1b8] sm:$0xff]  ;;  %v1516_v30 = vld [vmem:[%s3223_s2 + $0xc0] sm:$0xff] }
  0x52   :  { %871 = vst.msk [vmem:[#allocation5 + $0x40] sm:$0xf] %vm310_vm0, %v1580_v35  ;;  %v791_v48 = vadd.f32 %v1425_v14, %v774_v36  ;;  %v775_v25 = vmul.f32 %v1641_v42, %v1418_v31  ;;  %1650 = vtanh.f32 %v1000_v37  ;;  %v1001_v49 = vadd.f32 %v993_v26, %v947_v39  ;;  %v1488_v23 = vld [vmem:[%s3222_s1 + $0x2b8] sm:$0xff]  ;;  %v1517_v37 = vld [vmem:[%s3223_s2 + $0xc8] sm:$0xff] }
  0x53   :  { %v1643_v53 = vpop.eup %1642  ;;  %872 = vst.msk [vmem:[#allocation5 + $0x44] sm:$0xf] %vm310_vm0, %v1581_v43  ;;  %v1582_v54 = vpack.c.bf16 %v790_v44, %v790_v44  ;;  %v948_v38 = vadd.f32 %v940_v47, %v902_v34  ;;  %v994_v57 = vmul.f32 %v1502_v40, %v2249_v61  ;;  %v903_v58 = vmul.f32 %v1467_v41, %v2223_v51  ;;  %v1506_v29 = vld [vmem:[%s3222_s1 + $0x2f8] sm:$0xff]  ;;  %v54_v41 = vld [vmem:[%s3224_s3] sm:$0xff]  ;;  %s2492_s1 = sld [smem:[#allocation2 + $0x280]] }
  0x54   :  { %v1583_v62 = vpack.c.bf16 %v791_v48, %v791_v48  ;;  %v792_v63 = vadd.f32 %v1426_v45, %v775_v25  ;;  %v776_v0 = vmul.f32 %v1643_v53, %v1419_v46  ;;  %1652 = vtanh.f32 %v1001_v49  ;;  %v1525_v25 = vld [vmem:[%s3223_s2 + $0x1c8] sm:$0xff] }
  0x55   :  { %v1645_v4 = vpop.eup %1644  ;;  %873 = vst.msk [vmem:[#allocation5 + $0x48] sm:$0xf] %vm310_vm0, %v1582_v54  ;;  %v1002_v7 = vadd.f32 %v994_v57, %v948_v38  ;;  %v941_v8 = vmul.f32 %v1485_v50, %v2246_v60  ;;  %v995_v3 = vmul.f32 %v1503_v52, %v2249_v61  ;;  %v904_v10 = vmul.f32 %v1468_v33, %v2223_v51  ;;  %v1218_v50 = vld [vmem:[%s3224_s3 + $0x80] sm:$0xff]  ;;  %v1526_v57 = vld [vmem:[%s3223_s2 + $0x1d0] sm:$0xff] }
  0x56   :  { %874 = vst.msk [vmem:[#allocation5 + $0x4c] sm:$0xf] %vm310_vm0, %v1583_v62  ;;  %v1584_v11 = vpack.c.bf16 %v792_v63, %v792_v63  ;;  %v793_v12 = vadd.f32 %v1427_v55, %v776_v0  ;;  %v777_v13 = vmul.f32 %v1645_v4, %v1420_v56  ;;  %v942_v15 = vmul.f32 %v1486_v59, %v2246_v60  ;;  %v55_v55 = vld [vmem:[%s3224_s3 + $0x8] sm:$0xff]  ;;  %v1519_v4 = vld [vmem:[%s3223_s2 + $0xd8] sm:$0xff] }
  0x57   :  { %v1647_v18 = vpop.eup %1646  ;;  %1654 = vtanh.f32 %v1002_v7  ;;  %v949_v20 = vadd.f32 %v941_v8, %v903_v58  ;;  %v996_v21 = vmul.f32 %v1504_v1, %v2249_v61  ;;  %v905_v22 = vmul.f32 %v1469_v2, %v2223_v51  ;;  %v1201_v63 = vld [vmem:[%s3224_s3 + $0x48] sm:$0xff]  ;;  %v1202_v7 = vld [vmem:[%s3224_s3 + $0x50] sm:$0xff] }
  0x58   :  { %875 = vst.msk [vmem:[#allocation5 + $0x50] sm:$0xf] %vm310_vm0, %v1584_v11  ;;  %v1585_v24 = vpack.c.bf16 %v793_v12, %v793_v12  ;;  %v794_v26 = vadd.f32 %v1428_v5, %v777_v13  ;;  %v778_v27 = vmul.f32 %v1647_v18, %v1421_v6  ;;  %v950_v28 = vadd.f32 %v942_v15, %v904_v10  ;;  %v1219_v0 = vld [vmem:[%s3224_s3 + $0x88] sm:$0xff]  ;;  %v56_v6 = vld [vmem:[%s3224_s3 + $0x10] sm:$0xff]  ;;  %v57_v12 = vld [vmem:[%s3224_s3 + $0x18] sm:$0xff] }
  0x59   :  { %v1003_v14 = vadd.f32 %v995_v3, %v949_v20  ;;  %v943_v31 = vmul.f32 %v1487_v16, %v2246_v60  ;;  %v997_v32 = vmul.f32 %v1505_v17, %v2249_v61  ;;  %v906_v34 = vmul.f32 %v1470_v9, %v2223_v51  ;;  %v1524_v51 = vld [vmem:[%s3223_s2 + $0x1c0] sm:$0xff]  ;;  %v1220_v11 = vld [vmem:[%s3224_s3 + $0x90] sm:$0xff]  ;;  %v1527_v17 = vld [vmem:[%s3223_s2 + $0x1d8] sm:$0xff] }
  0x5a   :  { %876 = vst.msk [vmem:[#allocation5 + $0x54] sm:$0xf] %vm310_vm0, %v1585_v24  ;;  %v1586_v35 = vpack.c.bf16 %v794_v26, %v794_v26  ;;  %v795_v36 = vadd.f32 %v1429_v19, %v778_v27  ;;  %v1004_v39 = vadd.f32 %v996_v21, %v950_v28  ;;  %v944_v40 = vmul.f32 %v1488_v23, %v2246_v60  ;;  %v1200_v60 = vld [vmem:[%s3224_s3 + $0x40] sm:$0xff]  ;;  %v1203_v19 = vld [vmem:[%s3224_s3 + $0x58] sm:$0xff] }
  0x5b   :  { %v1649_v42 = vpop.eup %1648  ;;  %1656 = vtanh.f32 %v1003_v14  ;;  %v951_v43 = vadd.f32 %v943_v31, %v905_v22  ;;  %v998_v44 = vmul.f32 %v1506_v29, %v2249_v61  ;;  %v2396_v45 = vstv %s2332_s21  ;;  %v1518_v61 = vld [vmem:[%s3223_s2 + $0xd0] sm:$0xff]  ;;  %v1221_v24 = vld [vmem:[%s3224_s3 + $0x98] sm:$0xff]  ;;  %v58_v26 = vld [vmem:[%s3224_s3 + $0x20] sm:$0xff] }
  0x5c   :  { %v1651_v46 = vpop.eup %1650  ;;  %877 = vst.msk [vmem:[#allocation5 + $0x58] sm:$0xf] %vm310_vm0, %v1586_v35  ;;  %v1587_v47 = vpack.c.bf16 %v795_v36, %v795_v36  ;;  %v1051_v48 = vmul.f32 %v1649_v42, %v1516_v30  ;;  %1658 = vtanh.f32 %v1004_v39  ;;  %v952_v49 = vadd.f32 %v944_v40, %v906_v34  ;;  %v1204_v27 = vld [vmem:[%s3224_s3 + $0x60] sm:$0xff]  ;;  %v1521_v34 = vld [vmem:[%s3223_s2 + $0xe8] sm:$0xff] }
  0x5d   :  { %v1052_v52 = vmul.f32 %v1651_v46, %v1517_v37  ;;  %v1005_v33 = vadd.f32 %v997_v32, %v951_v43  ;;  %v63_v53 = vmul.f32 %v2396_v45, %v54_v41  ;;  %v2413_v54 = vstv %s2350_s14  ;;  %v1520_v29 = vld [vmem:[%s3223_s2 + $0xe0] sm:$0xff] }
  0x5e   :  { %v1653_v56 = vpop.eup %1652  ;;  %878 = vst.msk [vmem:[#allocation5 + $0x5c] sm:$0xf] %vm310_vm0, %v1587_v47  ;;  %v1068_v38 = vadd.f32 %v1524_v51, %v1051_v48  ;;  %v1006_v58 = vadd.f32 %v998_v44, %v952_v49  ;;  %v109_v59 = vmul.f32 %v1200_v60, %v2413_v54  ;;  %v2424_v62 = vstv %s2363_s8  ;;  %v1222_v37 = vld [vmem:[%s3224_s3 + $0xa0] sm:$0xff]  ;;  %v59_v44 = vld [vmem:[%s3224_s3 + $0x28] sm:$0xff] }
  0x5f   :  { %v1069_v1 = vadd.f32 %v1525_v25, %v1052_v52  ;;  %v1053_v2 = vmul.f32 %v1653_v56, %v1518_v61  ;;  %1660 = vtanh.f32 %v1005_v33  ;;  %v163_v5 = vmul.f32 %v1218_v50, %v2424_v62  ;;  %v1528_v40 = vld [vmem:[%s3223_s2 + $0x1e0] sm:$0xff]  ;;  %v1529_v48 = vld [vmem:[%s3223_s2 + $0x1e8] sm:$0xff]  ;;  %v1522_v33 = vld [vmem:[%s3223_s2 + $0xf0] sm:$0xff] }
  0x60   :  { %v1588_v8 = vpack.c.bf16 %v1068_v38, %v1068_v38  ;;  %1662 = vtanh.f32 %v1006_v58  ;;  %v117_v3 = vadd.f32 %v109_v59, %v63_v53  ;;  %v64_v10 = vmul.f32 %v2396_v45, %v55_v55  ;;  %v1205_v49 = vld [vmem:[%s3224_s3 + $0x68] sm:$0xff]  ;;  %v60_v56 = vld [vmem:[%s3224_s3 + $0x30] sm:$0xff]  ;;  %v1523_v58 = vld [vmem:[%s3223_s2 + $0xf8] sm:$0xff] }
  0x61   :  { %v1655_v13 = vpop.eup %1654  ;;  %v1589_v15 = vpack.c.bf16 %v1069_v1, %v1069_v1  ;;  %v1070_v16 = vadd.f32 %v1526_v57, %v1053_v2  ;;  %v110_v9 = vmul.f32 %v1201_v63, %v2413_v54  ;;  %v164_v18 = vmul.f32 %v1219_v0, %v2424_v62  ;;  %v1223_v50 = vld [vmem:[%s3224_s3 + $0xa8] sm:$0xff]  ;;  %v1530_v57 = vld [vmem:[%s3223_s2 + $0x1f0] sm:$0xff] }
  0x62   :  { %1151 = vst.msk [vmem:[#allocation5 + $0x60] sm:$0xf] %vm310_vm0, %v1588_v8  ;;  %v1054_v20 = vmul.f32 %v1655_v13, %v1519_v4  ;;  %v171_v21 = vadd.f32 %v163_v5, %v117_v3  ;;  %v65_v22 = vmul.f32 %v2396_v45, %v56_v6  ;;  %v111_v23 = vmul.f32 %v1202_v7, %v2413_v54  ;;  %v1206_v6 = vld [vmem:[%s3224_s3 + $0x70] sm:$0xff]  ;;  %v61_v8 = vld [vmem:[%s3224_s3 + $0x38] sm:$0xff] }
  0x63   :  { %1152 = vst.msk [vmem:[#allocation5 + $0x64] sm:$0xf] %vm310_vm0, %v1589_v15  ;;  %v1590_v28 = vpack.c.bf16 %v1070_v16, %v1070_v16  ;;  %v118_v30 = vadd.f32 %v110_v9, %v64_v10  ;;  %v165_v14 = vmul.f32 %v1220_v11, %v2424_v62  ;;  %v66_v31 = vmul.f32 %v2396_v45, %v57_v12  ;;  %v1224_v7 = vld [vmem:[%s3224_s3 + $0xb0] sm:$0xff]  ;;  %v1531_v12 = vld [vmem:[%s3223_s2 + $0x1f8] sm:$0xff]  ;;  %s2694_s2 = sld [smem:[#allocation2 + $0x301]] }
  0x64   :  { %v1071_v32 = vadd.f32 %v1527_v17, %v1054_v20  ;;  %1664 = vtanh.f32 %v171_v21  ;;  %v119_v35 = vadd.f32 %v111_v23, %v65_v22  ;;  %v112_v36 = vmul.f32 %v1203_v19, %v2413_v54  ;;  %v1207_v15 = vld [vmem:[%s3224_s3 + $0x78] sm:$0xff]  ;;  %v1234_v20 = vld [vmem:[%s3224_s3 + $0xc0] sm:$0xff] }
  0x65   :  { %v1657_v39 = vpop.eup %1656  ;;  %1153 = vst.msk [vmem:[#allocation5 + $0x68] sm:$0xf] %vm310_vm0, %v1590_v28  ;;  %v172_v41 = vadd.f32 %v164_v18, %v118_v30  ;;  %v166_v42 = vmul.f32 %v1221_v24, %v2424_v62  ;;  %v67_v51 = vmul.f32 %v2396_v45, %v58_v26  ;;  %v113_v43 = vmul.f32 %v1204_v27, %v2413_v54  ;;  %v1225_v16 = vld [vmem:[%s3224_s3 + $0xb8] sm:$0xff]  ;;  %v1242_v26 = vld [vmem:[%s3224_s3 + $0x100] sm:$0xff] }
  0x66   :  { %v1659_v60 = vpop.eup %1658  ;;  %v1591_v46 = vpack.c.bf16 %v1071_v32, %v1071_v32  ;;  %v1055_v47 = vmul.f32 %v1657_v39, %v1520_v29  ;;  %v173_v25 = vadd.f32 %v165_v14, %v119_v35  ;;  %v120_v61 = vadd.f32 %v112_v36, %v66_v31  ;;  %v1268_v30 = vld [vmem:[%s3224_s3 + $0x140] sm:$0xff]  ;;  %v1235_v39 = vld [vmem:[%s3224_s3 + $0xc8] sm:$0xff] }
  0x67   :  { %v1056_v52 = vmul.f32 %v1659_v60, %v1521_v34  ;;  %1666 = vtanh.f32 %v172_v41  ;;  %v121_v53 = vadd.f32 %v113_v43, %v67_v51  ;;  %v167_v55 = vmul.f32 %v1222_v37, %v2424_v62  ;;  %v1287_v41 = vld [vmem:[%s3224_s3 + $0x188] sm:$0xff] }
  0x68   :  { %1154 = vst.msk [vmem:[#allocation5 + $0x6c] sm:$0xf] %vm310_vm0, %v1591_v46  ;;  %v1072_v38 = vadd.f32 %v1528_v40, %v1055_v47  ;;  %1668 = vtanh.f32 %v173_v25  ;;  %v174_v59 = vadd.f32 %v166_v42, %v120_v61  ;;  %v68_v63 = vmul.f32 %v2396_v45, %v59_v44  ;;  %v1236_v42 = vld [vmem:[%s3224_s3 + $0xd0] sm:$0xff]  ;;  %v1305_v46 = vld [vmem:[%s3224_s3 + $0x1c8] sm:$0xff] }
  0x69   :  { %v1661_v0 = vpop.eup %1660  ;;  %v1073_v1 = vadd.f32 %v1529_v48, %v1056_v52  ;;  %v175_v2 = vadd.f32 %v167_v55, %v121_v53  ;;  %v114_v4 = vmul.f32 %v1205_v49, %v2413_v54  ;;  %v168_v5 = vmul.f32 %v1223_v50, %v2424_v62  ;;  %v1243_v25 = vld [vmem:[%s3224_s3 + $0x108] sm:$0xff]  ;;  %v1244_v61 = vld [vmem:[%s3224_s3 + $0x110] sm:$0xff] }
  0x6a   :  { %v1663_v3 = vpop.eup %1662  ;;  %v1592_v10 = vpack.c.bf16 %v1072_v38, %v1072_v38  ;;  %v1057_v11 = vmul.f32 %v1661_v0, %v1522_v33  ;;  %1670 = vtanh.f32 %v174_v59  ;;  %v69_v13 = vmul.f32 %v2396_v45, %v60_v56  ;;  %v1270_v33 = vld [vmem:[%s3224_s3 + $0x150] sm:$0xff]  ;;  %v1237_v56 = vld [vmem:[%s3224_s3 + $0xd8] sm:$0xff] }
  0x6b   :  { %v1593_v17 = vpack.c.bf16 %v1073_v1, %v1073_v1  ;;  %v1058_v9 = vmul.f32 %v1663_v3, %v1523_v58  ;;  %1672 = vtanh.f32 %v175_v2  ;;  %v122_v18 = vadd.f32 %v114_v4, %v68_v63  ;;  %v1288_v58 = vld [vmem:[%s3224_s3 + $0x190] sm:$0xff]  ;;  %v1238_v1 = vld [vmem:[%s3224_s3 + $0xe0] sm:$0xff] }
  0x6c   :  { %1155 = vst.msk [vmem:[#allocation5 + $0x70] sm:$0xf] %vm310_vm0, %v1592_v10  ;;  %v1074_v19 = vadd.f32 %v1530_v57, %v1057_v11  ;;  %v115_v21 = vmul.f32 %v1206_v6, %v2413_v54  ;;  %v169_v22 = vmul.f32 %v1224_v7, %v2424_v62  ;;  %v70_v23 = vmul.f32 %v2396_v45, %v61_v8  ;;  %v1286_v45 = vld [vmem:[%s3224_s3 + $0x180] sm:$0xff]  ;;  %v1306_v59 = vld [vmem:[%s3224_s3 + $0x1d0] sm:$0xff]  ;;  %v1245_v6 = vld [vmem:[%s3224_s3 + $0x118] sm:$0xff] }
  0x6d   :  { %1156 = vst.msk [vmem:[#allocation5 + $0x74] sm:$0xf] %vm310_vm0, %v1593_v17  ;;  %v1075_v24 = vadd.f32 %v1531_v12, %v1058_v9  ;;  %v176_v27 = vadd.f32 %v168_v5, %v122_v18  ;;  %v116_v28 = vmul.f32 %v1207_v15, %v2413_v54  ;;  %v170_v29 = vmul.f32 %v1225_v16, %v2424_v62  ;;  %v1304_v54 = vld [vmem:[%s3224_s3 + $0x1c0] sm:$0xff]  ;;  %v1269_v62 = vld [vmem:[%s3224_s3 + $0x148] sm:$0xff]  ;;  %v1271_v10 = vld [vmem:[%s3224_s3 + $0x158] sm:$0xff] }
  0x6e   :  { %v1665_v14 = vpop.eup %1664  ;;  %v1594_v31 = vpack.c.bf16 %v1074_v19, %v1074_v19  ;;  %v123_v32 = vadd.f32 %v115_v21, %v69_v13  ;;  %v2563_v34 = vstv %s2492_s1  ;;  %v2566_v35 = vstv %s2503_s6  ;;  %v1246_v15 = vld [vmem:[%s3224_s3 + $0x120] sm:$0xff]  ;;  %v1289_v9 = vld [vmem:[%s3224_s3 + $0x198] sm:$0xff] }
  0x6f   :  { %v1595_v36 = vpack.c.bf16 %v1075_v24, %v1075_v24  ;;  %v237_v37 = vmul.f32 %v1665_v14, %v1234_v20  ;;  %1674 = vtanh.f32 %v176_v27  ;;  %v124_v40 = vadd.f32 %v116_v28, %v70_v23  ;;  %v1307_v18 = vld [vmem:[%s3224_s3 + $0x1d8] sm:$0xff]  ;;  %v1290_v23 = vld [vmem:[%s3224_s3 + $0x1a0] sm:$0xff]  ;;  %v1239_v27 = vld [vmem:[%s3224_s3 + $0xe8] sm:$0xff] }
  0x70   :  { %1157 = vst.msk [vmem:[#allocation5 + $0x78] sm:$0xf] %vm310_vm0, %v1594_v31  ;;  %v177_v51 = vadd.f32 %v169_v22, %v123_v32  ;;  %v358_v43 = vmul.f32 %v1268_v30, %v2563_v34  ;;  %v404_v44 = vmul.f32 %v1286_v45, %v2566_v35  ;;  %v2587_v60 = vstv %s2520_s19  ;;  %v1272_v22 = vld [vmem:[%s3224_s3 + $0x160] sm:$0xff]  ;;  %s1769_s19 = smov [#allocation5]   ;;  %v1273_v32 = vld [vmem:[%s3224_s3 + $0x168] sm:$0xff] }
  0x71   :  { %v1667_v47 = vpop.eup %1666  ;;  %1158 = vst.msk [vmem:[#allocation5 + $0x7c] sm:$0xf] %vm310_vm0, %v1595_v36  ;;  %v254_v48 = vadd.f32 %v1242_v26, %v237_v37  ;;  %v178_v49 = vadd.f32 %v170_v29, %v124_v40  ;;  %v458_v50 = vmul.f32 %v1304_v54, %v2587_v60  ;;  %v359_v52 = vmul.f32 %v1269_v62, %v2563_v34  ;;  %s1173_s18 = sshll.u32 %s1769_s19, 4  ;;  %v1308_v30 = vld [vmem:[%s3224_s3 + $0x1e0] sm:$0xff]  ;;  %v1291_v54 = vld [vmem:[%s3224_s3 + $0x1a8] sm:$0xff]  ;;  %s2682_s18 = int_to_ptr.vmem [resolvable:$true] %s1173_s18 }
  0x72   :  { %v1669_v53 = vpop.eup %1668  ;;  %v238_v55 = vmul.f32 %v1667_v47, %v1235_v39  ;;  %1676 = vtanh.f32 %v177_v51  ;;  %v412_v38 = vadd.f32 %v404_v44, %v358_v43  ;;  %v405_v57 = vmul.f32 %v1287_v41, %v2566_v35  ;;  %v1247_v37 = vld [vmem:[%s3224_s3 + $0x128] sm:$0xff]  ;;  %v1274_v51 = vld [vmem:[%s3224_s3 + $0x170] sm:$0xff]  ;;  %s1740_s12 = scalar_lea.vmem %s2682_s18, 2048  ;;  %p1745_p6 = scmp.lt.s32.totalorder %s2682_s18, %s2682_s18 }
  0x73   :  { %v270_v63 = vmul.f32 0.25, %v254_v48  ;;  %v239_v0 = vmul.f32 %v1669_v53, %v1236_v42  ;;  %1678 = vtanh.f32 %v178_v49  ;;  %v459_v2 = vmul.f32 %v1305_v46, %v2587_v60  ;;  %v1309_v42 = vld [vmem:[%s3224_s3 + $0x1e8] sm:$0xff]  ;;  %v1240_v46 = vld [vmem:[%s3224_s3 + $0xf0] sm:$0xff]  ;;  %v1241_v49 = vld [vmem:[%s3224_s3 + $0xf8] sm:$0xff]  ;;  %p1741_p5 = scmp.ne.s32.totalorder %s2682_s18, %s1740_s12  ;;  %p1746_p7 = scmp.lt.s32.totalorder %s1740_s12, %s1740_s12 }
  0x74   :  { %v1671_v4 = vpop.eup %1670  ;;  %v255_v5 = vadd.f32 %v1243_v25, %v238_v55  ;;  %v466_v7 = vadd.f32 %v458_v50, %v412_v38  ;;  %v413_v8 = vadd.f32 %v405_v57, %v359_v52  ;;  %v360_v3 = vmul.f32 %v1270_v33, %v2563_v34  ;;  %v1248_v47 = vld [vmem:[%s3224_s3 + $0x130] sm:$0xff]  ;;  %v1249_v50 = vld [vmem:[%s3224_s3 + $0x138] sm:$0xff] }
  0x75   :  { %v1673_v11 = vpop.eup %1672  ;;  %320 = vst.msk [vmem:[%s3226_s5] sm:$0xff] %vm319_vm1, %v270_v63  ;;  %v256_v12 = vadd.f32 %v1244_v61, %v239_v0  ;;  %v240_v13 = vmul.f32 %v1671_v4, %v1237_v56  ;;  %v406_v16 = vmul.f32 %v1288_v58, %v2566_v35  ;;  %v460_v17 = vmul.f32 %v1306_v59, %v2587_v60  ;;  %v1292_v61 = vld [vmem:[%s3224_s3 + $0x1b0] sm:$0xff]  ;;  %p1747_p8 = por %p1746_p7, %p1745_p6 }
  0x76   :  { %v271_v19 = vmul.f32 0.25, %v255_v5  ;;  %v241_v20 = vmul.f32 %v1673_v11, %v1238_v1  ;;  %1680 = vtanh.f32 %v466_v7  ;;  %v467_v21 = vadd.f32 %v459_v2, %v413_v8  ;;  %v1310_v55 = vld [vmem:[%s3224_s3 + $0x1f0] sm:$0xff] }
  0x77   :  { %v272_v24 = vmul.f32 0.25, %v256_v12  ;;  %v257_v26 = vadd.f32 %v1245_v6, %v240_v13  ;;  %v414_v28 = vadd.f32 %v406_v16, %v360_v3  ;;  %v361_v29 = vmul.f32 %v1271_v10, %v2563_v34  ;;  %p1748_p9 = pnand %p1747_p8, %p1741_p5 }
  0x78   :  { %321 = vst.msk [vmem:[%s3226_s5 + $0x8] sm:$0xff] %vm319_vm1, %v271_v19  ;;  %v258_v45 = vadd.f32 %v1246_v15, %v241_v20  ;;  %1682 = vtanh.f32 %v467_v21  ;;  %v407_v14 = vmul.f32 %v1289_v9, %v2566_v35  ;;  %v461_v31 = vmul.f32 %v1307_v18, %v2587_v60 }
  0x79   :  { %v1675_v62 = vpop.eup %1674  ;;  %322 = vst.msk [vmem:[%s3226_s5 + $0x10] sm:$0xff] %vm319_vm1, %v272_v24  ;;  %v273_v36 = vmul.f32 0.25, %v257_v26  ;;  %v468_v39 = vadd.f32 %v460_v17, %v414_v28  ;;  %v362_v40 = vmul.f32 %v1272_v22, %v2563_v34  ;;  %v408_v41 = vmul.f32 %v1290_v23, %v2566_v35 }
  0x7a   :  { %v274_v43 = vmul.f32 0.25, %v258_v45  ;;  %v242_v44 = vmul.f32 %v1675_v62, %v1239_v27  ;;  %v415_v48 = vadd.f32 %v407_v14, %v361_v29  ;;  %v462_v25 = vmul.f32 %v1308_v30, %v2587_v60 }
  0x7b   :  { %323 = vst.msk [vmem:[%s3226_s5 + $0x18] sm:$0xff] %vm319_vm1, %v273_v36  ;;  %1684 = vtanh.f32 %v468_v39  ;;  %v416_v52 = vadd.f32 %v408_v41, %v362_v40  ;;  %v363_v33 = vmul.f32 %v1273_v32, %v2563_v34  ;;  %v409_v53 = vmul.f32 %v1291_v54, %v2566_v35 }
  0x7c   :  { %v1677_v56 = vpop.eup %1676  ;;  %324 = vst.msk [vmem:[%s3226_s5 + $0x20] sm:$0xff] %vm319_vm1, %v274_v43  ;;  %v259_v38 = vadd.f32 %v1247_v37, %v242_v44  ;;  %v469_v57 = vadd.f32 %v461_v31, %v415_v48  ;;  %v463_v58 = vmul.f32 %v1309_v42, %v2587_v60  ;;  %v364_v59 = vmul.f32 %v1274_v51, %v2563_v34 }
  0x7d   :  { %1751 = shalt.err (!%p1748_p9)
}
  0x7e   :  { %s1752_s30 = scalar_lea.hbm %s3225_s4, 2048 }
  0x7f   :  { %p1753_p10 = scmp.ne.s32.totalorder %s3225_s4, %s1752_s30  ;;  %p1756_p11 = scmp.lt.u32.totalorder %s1752_s30, %s3225_s4 }
  0x81   :  { %p1758_p12 = pnand %p1756_p11, %p1753_p10 }
  0x83   :  { %1761 = shalt.err (!%p1758_p12)
}
  0x84   :  { %1179 = dma.vmem_to_hbm [thread:$0]  %s2682_s18, 2048, %s3225_s4, [#allocation3], %s1767_s23, %s1767_s23, %s1768_s24   ;;  %v1679_v63 = vpop.eup %1678  ;;  %v243_v0 = vmul.f32 %v1677_v56, %v1240_v46  ;;  %v470_v1 = vadd.f32 %v462_v25, %v416_v52  ;;  %v417_v2 = vadd.f32 %v409_v53, %v363_v33  ;;  %v410_v4 = vmul.f32 %v1292_v61, %v2566_v35 }
  0x85   :  { %v1275_v5 = vld [vmem:[%s3224_s3 + $0x178] sm:$0xff]  ;;  %v275_v8 = vmul.f32 0.25, %v259_v38  ;;  %v244_v3 = vmul.f32 %v1679_v63, %v1241_v49  ;;  %v1328_v10 = vld [vmem:[%s3224_s3 + $0x200] sm:$0xff]  ;;  %1686 = vtanh.f32 %v469_v57  ;;  %v464_v11 = vmul.f32 %v1310_v55, %v2587_v60  ;;  %v1681_v17 = vpop.eup %1680  ;;  %v1329_v18 = vld [vmem:[%s3224_s3 + $0x208] sm:$0xff]  ;;  %s2873_s27 = sld [smem:[#allocation2 + $0x380]]  ;;  %s2875_s7 = sld [smem:[#allocation2 + $0x381]] }
  0x86   :  { %v1293_v6 = vld [vmem:[%s3224_s3 + $0x1b8] sm:$0xff]  ;;  %v260_v12 = vadd.f32 %v1248_v47, %v243_v0  ;;  %v1336_v13 = vld [vmem:[%s3224_s3 + $0x240] sm:$0xff]  ;;  %1688 = vtanh.f32 %v470_v1  ;;  %v471_v15 = vadd.f32 %v463_v58, %v417_v2  ;;  %v418_v16 = vadd.f32 %v410_v4, %v364_v59  ;;  %v1337_v19 = vld [vmem:[%s3224_s3 + $0x248] sm:$0xff]  ;;  %s2891_s6 = sld [smem:[#allocation2 + $0x382]] }
  0x87   :  { %v1311_v7 = vld [vmem:[%s3224_s3 + $0x1f8] sm:$0xff]  ;;  %325 = vst.msk [vmem:[%s3226_s5 + $0x28] sm:$0xff] %vm319_vm1, %v275_v8  ;;  %v261_v9 = vadd.f32 %v1249_v50, %v244_v3  ;;  %v365_v20 = vmul.f32 %v1275_v5, %v2563_v34  ;;  %v411_v21 = vmul.f32 %v1293_v6, %v2566_v35  ;;  %v1370_v23 = vld [vmem:[%s3224_s3 + $0x280] sm:$0xff]  ;;  %v533_v26 = vmul.f32 %v1681_v17, %v1328_v10  ;;  %v1371_v35 = vld [vmem:[%s3224_s3 + $0x288] sm:$0xff] }
  0x88   :  { %v465_v22 = vmul.f32 %v1311_v7, %v2587_v60  ;;  %v276_v24 = vmul.f32 0.25, %v260_v12  ;;  %1690 = vtanh.f32 %v471_v15  ;;  %v472_v27 = vadd.f32 %v464_v11, %v418_v16  ;;  %v1388_v28 = vld [vmem:[%s3224_s3 + $0x2c0] sm:$0xff]  ;;  %v1683_v60 = vpop.eup %1682  ;;  %v1389_v31 = vld [vmem:[%s3224_s3 + $0x2c8] sm:$0xff]  ;;  %v1330_v36 = vld [vmem:[%s3224_s3 + $0x210] sm:$0xff] }
  0x89   :  { %v1406_v34 = vld [vmem:[%s3224_s3 + $0x300] sm:$0xff]  ;;  %v277_v29 = vmul.f32 0.25, %v261_v9  ;;  %v419_v30 = vadd.f32 %v411_v21, %v365_v20  ;;  %v2782_v45 = vstv %s2680_s28  ;;  %v2785_v14 = vstv %s2694_s2  ;;  %v1407_v32 = vld [vmem:[%s3224_s3 + $0x308] sm:$0xff]  ;;  %v1685_v47 = vpop.eup %1684 }
  0x8a   :  { %326 = vst.msk [vmem:[%s3226_s5 + $0x30] sm:$0xff] %vm319_vm1, %v276_v24  ;;  %v550_v54 = vadd.f32 %v1336_v13, %v533_v26  ;;  %v534_v62 = vmul.f32 %v1683_v60, %v1329_v18  ;;  %1692 = vtanh.f32 %v472_v27  ;;  %v638_v37 = vmul.f32 %v1370_v23, %v2782_v45  ;;  %v1372_v39 = vld [vmem:[%s3224_s3 + $0x290] sm:$0xff]  ;;  %v1373_v46 = vld [vmem:[%s3224_s3 + $0x298] sm:$0xff]  ;;  %v1374_v57 = vld [vmem:[%s3224_s3 + $0x2a0] sm:$0xff] }
  0x8b   :  { %327 = vst.msk [vmem:[%s3226_s5 + $0x38] sm:$0xff] %vm319_vm1, %v277_v29  ;;  %v473_v40 = vadd.f32 %v465_v22, %v419_v30  ;;  %v684_v41 = vmul.f32 %v1388_v28, %v2785_v14  ;;  %v2810_v42 = vstv %s2711_s10  ;;  %v639_v51 = vmul.f32 %v1371_v35, %v2782_v45  ;;  %v1390_v43 = vld [vmem:[%s3224_s3 + $0x2d0] sm:$0xff]  ;;  %v1391_v52 = vld [vmem:[%s3224_s3 + $0x2d8] sm:$0xff] }
  0x8c   :  { %v1408_v44 = vld [vmem:[%s3224_s3 + $0x310] sm:$0xff]  ;;  %1352 = vst.msk [vmem:[%s3226_s5 + $0x40] sm:$0xff] %vm319_vm1, %v550_v54  ;;  %v551_v48 = vadd.f32 %v1337_v19, %v534_v62  ;;  %v738_v61 = vmul.f32 %v1406_v34, %v2810_v42  ;;  %v685_v49 = vmul.f32 %v1389_v31, %v2785_v14  ;;  %v739_v50 = vmul.f32 %v1407_v32, %v2810_v42  ;;  %v1409_v33 = vld [vmem:[%s3224_s3 + $0x318] sm:$0xff]  ;;  %v1332_v58 = vld [vmem:[%s3224_s3 + $0x220] sm:$0xff] }
  0x8d   :  { %v1338_v25 = vld [vmem:[%s3224_s3 + $0x250] sm:$0xff]  ;;  %v535_v53 = vmul.f32 %v1685_v47, %v1330_v36  ;;  %v1331_v55 = vld [vmem:[%s3224_s3 + $0x218] sm:$0xff]  ;;  %1694 = vtanh.f32 %v473_v40  ;;  %v692_v56 = vadd.f32 %v684_v41, %v638_v37  ;;  %v640_v38 = vmul.f32 %v1372_v39, %v2782_v45  ;;  %v1392_v2 = vld [vmem:[%s3224_s3 + $0x2e0] sm:$0xff] }
  0x8e   :  { %1353 = vst.msk [vmem:[%s3226_s5 + $0x48] sm:$0xff] %vm319_vm1, %v551_v48  ;;  %v693_v59 = vadd.f32 %v685_v49, %v639_v51  ;;  %v686_v63 = vmul.f32 %v1390_v43, %v2785_v14  ;;  %v740_v0 = vmul.f32 %v1408_v44, %v2810_v42  ;;  %v641_v1 = vmul.f32 %v1373_v46, %v2782_v45  ;;  %v1339_v6 = vld [vmem:[%s3224_s3 + $0x258] sm:$0xff]  ;;  %v1410_v10 = vld [vmem:[%s3224_s3 + $0x320] sm:$0xff]  ;;  %v1333_v15 = vld [vmem:[%s3224_s3 + $0x228] sm:$0xff] }
  0x8f   :  { %v1687_v4 = vpop.eup %1686  ;;  %v552_v5 = vadd.f32 %v1338_v25, %v535_v53  ;;  %v746_v7 = vadd.f32 %v738_v61, %v692_v56  ;;  %v687_v8 = vmul.f32 %v1391_v52, %v2785_v14  ;;  %v741_v3 = vmul.f32 %v1409_v33, %v2810_v42  ;;  %v1340_v13 = vld [vmem:[%s3224_s3 + $0x260] sm:$0xff]  ;;  %v1375_v21 = vld [vmem:[%s3224_s3 + $0x2a8] sm:$0xff]  ;;  %v1334_v28 = vld [vmem:[%s3224_s3 + $0x230] sm:$0xff] }
  0x90   :  { %v1689_v11 = vpop.eup %1688  ;;  %v536_v12 = vmul.f32 %v1687_v4, %v1331_v55  ;;  %v747_v16 = vadd.f32 %v739_v50, %v693_v59  ;;  %v694_v17 = vadd.f32 %v686_v63, %v640_v38  ;;  %v642_v9 = vmul.f32 %v1374_v57, %v2782_v45  ;;  %v1393_v22 = vld [vmem:[%s3224_s3 + $0x2e8] sm:$0xff]  ;;  %v1376_v32 = vld [vmem:[%s3224_s3 + $0x2b0] sm:$0xff]  ;;  %v1377_v51 = vld [vmem:[%s3224_s3 + $0x2b8] sm:$0xff] }
  0x91   :  { %1354 = vst.msk [vmem:[%s3226_s5 + $0x50] sm:$0xff] %vm319_vm1, %v552_v5  ;;  %v537_v18 = vmul.f32 %v1689_v11, %v1332_v58  ;;  %1696 = vtanh.f32 %v746_v7  ;;  %v695_v19 = vadd.f32 %v687_v8, %v641_v1  ;;  %v688_v20 = vmul.f32 %v1392_v2, %v2785_v14  ;;  %v1411_v23 = vld [vmem:[%s3224_s3 + $0x328] sm:$0xff]  ;;  %v1394_v54 = vld [vmem:[%s3224_s3 + $0x2f0] sm:$0xff]  ;;  %v1395_v43 = vld [vmem:[%s3224_s3 + $0x2f8] sm:$0xff] }
  0x92   :  { %v1691_v24 = vpop.eup %1690  ;;  %v553_v26 = vadd.f32 %v1339_v6, %v536_v12  ;;  %v1341_v27 = vld [vmem:[%s3224_s3 + $0x268] sm:$0xff]  ;;  %1698 = vtanh.f32 %v747_v16  ;;  %v748_v34 = vadd.f32 %v740_v0, %v694_v17  ;;  %v742_v35 = vmul.f32 %v1410_v10, %v2810_v42  ;;  %v1412_v62 = vld [vmem:[%s3224_s3 + $0x330] sm:$0xff]  ;;  %v1335_v47 = vld [vmem:[%s3224_s3 + $0x238] sm:$0xff] }
  0x93   :  { %v554_v60 = vadd.f32 %v1340_v13, %v537_v18  ;;  %v538_v29 = vmul.f32 %v1691_v24, %v1333_v15  ;;  %v749_v30 = vadd.f32 %v741_v3, %v695_v19  ;;  %v696_v31 = vadd.f32 %v688_v20, %v642_v9  ;;  %v1342_v37 = vld [vmem:[%s3224_s3 + $0x270] sm:$0xff]  ;;  %v1413_v25 = vld [vmem:[%s3224_s3 + $0x338] sm:$0xff]  ;;  %v1430_v56 = vld [vmem:[%s3224_s3 + $0x340] sm:$0xff] }
  0x94   :  { %v1693_v36 = vpop.eup %1692  ;;  %1355 = vst.msk [vmem:[%s3226_s5 + $0x58] sm:$0xff] %vm319_vm1, %v553_v26  ;;  %1700 = vtanh.f32 %v748_v34  ;;  %v643_v39 = vmul.f32 %v1375_v21, %v2782_v45  ;;  %v689_v40 = vmul.f32 %v1393_v22, %v2785_v14  ;;  %v743_v41 = vmul.f32 %v1411_v23, %v2810_v42  ;;  %v1343_v61 = vld [vmem:[%s3224_s3 + $0x278] sm:$0xff]  ;;  %v1472_v58 = vld [vmem:[%s3224_s3 + $0x3c0] sm:$0xff]  ;;  %v1509_v8 = vld [vmem:[%s3224_s3 + $0x448] sm:$0xff] }
  0x95   :  { %1356 = vst.msk [vmem:[%s3226_s5 + $0x60] sm:$0xff] %vm319_vm1, %v554_v60  ;;  %v555_v44 = vadd.f32 %v1341_v27, %v538_v29  ;;  %v539_v46 = vmul.f32 %v1693_v36, %v1334_v28  ;;  %1702 = vtanh.f32 %v749_v30  ;;  %v750_v48 = vadd.f32 %v742_v35, %v696_v31  ;;  %v1490_v59 = vld [vmem:[%s3224_s3 + $0x400] sm:$0xff]  ;;  %v1431_v10 = vld [vmem:[%s3224_s3 + $0x348] sm:$0xff]  ;;  %v1474_v13 = vld [vmem:[%s3224_s3 + $0x3d0] sm:$0xff] }
  0x96   :  { %v697_v49 = vadd.f32 %v689_v40, %v643_v39  ;;  %v644_v50 = vmul.f32 %v1376_v32, %v2782_v45  ;;  %v690_v52 = vmul.f32 %v1394_v54, %v2785_v14  ;;  %v744_v33 = vmul.f32 %v1412_v62, %v2810_v42  ;;  %v1508_v4 = vld [vmem:[%s3224_s3 + $0x440] sm:$0xff]  ;;  %v1492_v20 = vld [vmem:[%s3224_s3 + $0x410] sm:$0xff]  ;;  %v1439_v24 = vld [vmem:[%s3224_s3 + $0x388] sm:$0xff] }
  0x97   :  { %v1695_v53 = vpop.eup %1694  ;;  %1357 = vst.msk [vmem:[%s3226_s5 + $0x68] sm:$0xff] %vm319_vm1, %v555_v44  ;;  %v556_v55 = vadd.f32 %v1342_v37, %v539_v46  ;;  %1704 = vtanh.f32 %v750_v48  ;;  %v645_v38 = vmul.f32 %v1377_v51, %v2782_v45  ;;  %v691_v57 = vmul.f32 %v1395_v43, %v2785_v14  ;;  %v1473_v45 = vld [vmem:[%s3224_s3 + $0x3c8] sm:$0xff]  ;;  %v1438_v16 = vld [vmem:[%s3224_s3 + $0x380] sm:$0xff]  ;;  %v1510_v21 = vld [vmem:[%s3224_s3 + $0x450] sm:$0xff] }
  0x98   :  { %v540_v63 = vmul.f32 %v1695_v53, %v1335_v47  ;;  %v751_v0 = vadd.f32 %v743_v41, %v697_v49  ;;  %v698_v1 = vadd.f32 %v690_v52, %v644_v50  ;;  %v745_v2 = vmul.f32 %v1413_v25, %v2810_v42  ;;  %v1491_v14 = vld [vmem:[%s3224_s3 + $0x408] sm:$0xff]  ;;  %v1432_v26 = vld [vmem:[%s3224_s3 + $0x350] sm:$0xff]  ;;  %v1475_v34 = vld [vmem:[%s3224_s3 + $0x3d8] sm:$0xff] }
  0x99   :  { %1358 = vst.msk [vmem:[%s3226_s5 + $0x70] sm:$0xff] %vm319_vm1, %v556_v55  ;;  %v699_v5 = vadd.f32 %v691_v57, %v645_v38  ;;  %v2971_v6 = vstv %s2873_s27  ;;  %v2974_v42 = vstv %s2875_s7  ;;  %v2977_v7 = vstv %s2891_s6 }
  0x9a   :  { %v557_v3 = vadd.f32 %v1343_v61, %v540_v63  ;;  %1706 = vtanh.f32 %v751_v0  ;;  %v752_v11 = vadd.f32 %v744_v33, %v698_v1  ;;  %v918_v12 = vmul.f32 %v1472_v58, %v2971_v6  ;;  %v1433_v60 = vld [vmem:[%s3224_s3 + $0x358] sm:$0xff]  ;;  %v1440_v62 = vld [vmem:[%s3224_s3 + $0x390] sm:$0xff]  ;;  %v1476_v41 = vld [vmem:[%s3224_s3 + $0x3e0] sm:$0xff] }
  0x9b   :  { %v1697_v15 = vpop.eup %1696  ;;  %v753_v17 = vadd.f32 %v745_v2, %v699_v5  ;;  %v964_v9 = vmul.f32 %v1490_v59, %v2974_v42  ;;  %v1018_v18 = vmul.f32 %v1508_v4, %v2977_v7  ;;  %v919_v19 = vmul.f32 %v1473_v45, %v2971_v6  ;;  %v1493_v31 = vld [vmem:[%s3224_s3 + $0x418] sm:$0xff]  ;;  %v1434_v47 = vld [vmem:[%s3224_s3 + $0x360] sm:$0xff]  ;;  %v1477_v55 = vld [vmem:[%s3224_s3 + $0x3e8] sm:$0xff] }
  0x9c   :  { %v1699_v22 = vpop.eup %1698  ;;  %1359 = vst.msk [vmem:[%s3226_s5 + $0x78] sm:$0xff] %vm319_vm1, %v557_v3  ;;  %v813_v23 = vmul.f32 %v1697_v15, %v1430_v56  ;;  %1708 = vtanh.f32 %v752_v11  ;;  %v965_v27 = vmul.f32 %v1491_v14, %v2974_v42  ;;  %v1019_v28 = vmul.f32 %v1509_v8, %v2977_v7  ;;  %v1511_v40 = vld [vmem:[%s3224_s3 + $0x458] sm:$0xff]  ;;  %v1494_v33 = vld [vmem:[%s3224_s3 + $0x420] sm:$0xff]  ;;  %v1495_v63 = vld [vmem:[%s3224_s3 + $0x428] sm:$0xff] }
  0x9d   :  { %v814_v35 = vmul.f32 %v1699_v22, %v1431_v10  ;;  %1710 = vtanh.f32 %v753_v17  ;;  %v972_v29 = vadd.f32 %v964_v9, %v918_v12  ;;  %v920_v30 = vmul.f32 %v1474_v13, %v2971_v6  ;;  %v1441_v46 = vld [vmem:[%s3224_s3 + $0x398] sm:$0xff]  ;;  %v1512_v53 = vld [vmem:[%s3224_s3 + $0x460] sm:$0xff]  ;;  %v1513_v0 = vld [vmem:[%s3224_s3 + $0x468] sm:$0xff] }
  0x9e   :  { %v1701_v32 = vpop.eup %1700  ;;  %v830_v54 = vadd.f32 %v1438_v16, %v813_v23  ;;  %v973_v36 = vadd.f32 %v965_v27, %v919_v19  ;;  %v966_v37 = vmul.f32 %v1492_v20, %v2974_v42  ;;  %v1020_v39 = vmul.f32 %v1510_v21, %v2977_v7  ;;  %v1442_v57 = vld [vmem:[%s3224_s3 + $0x3a0] sm:$0xff]  ;;  %v1435_v4 = vld [vmem:[%s3224_s3 + $0x368] sm:$0xff]  ;;  %v1478_v14 = vld [vmem:[%s3224_s3 + $0x3f0] sm:$0xff] }
  0x9f   :  { %v1703_v51 = vpop.eup %1702  ;;  %v831_v43 = vadd.f32 %v1439_v24, %v814_v35  ;;  %v815_v44 = vmul.f32 %v1701_v32, %v1432_v26  ;;  %v1026_v48 = vadd.f32 %v1018_v18, %v972_v29  ;;  %v921_v25 = vmul.f32 %v1475_v34, %v2971_v6  ;;  %v1496_v11 = vld [vmem:[%s3224_s3 + $0x430] sm:$0xff]  ;;  %v1479_v13 = vld [vmem:[%s3224_s3 + $0x3f8] sm:$0xff]  ;;  %v1443_v17 = vld [vmem:[%s3224_s3 + $0x3a8] sm:$0xff] }
  0xa0   :  { %1454 = vst.msk [vmem:[%s3226_s5 + $0x80] sm:$0xff] %vm319_vm1, %v830_v54  ;;  %v816_v61 = vmul.f32 %v1703_v51, %v1433_v60  ;;  %v1027_v49 = vadd.f32 %v1019_v28, %v973_v36  ;;  %v974_v50 = vadd.f32 %v966_v37, %v920_v30  ;;  %v967_v52 = vmul.f32 %v1493_v31, %v2974_v42  ;;  %v1514_v12 = vld [vmem:[%s3224_s3 + $0x470] sm:$0xff]  ;;  %v1437_v21 = vld [vmem:[%s3224_s3 + $0x378] sm:$0xff]  ;;  %v1532_v51 = vld [vmem:[%s3224_s3 + $0x480] sm:$0xff] }
  0xa1   :  { %v1705_v56 = vpop.eup %1704  ;;  %1455 = vst.msk [vmem:[%s3226_s5 + $0x88] sm:$0xff] %vm319_vm1, %v831_v43  ;;  %v832_v38 = vadd.f32 %v1440_v62, %v815_v44  ;;  %1712 = vtanh.f32 %v1026_v48  ;;  %v1021_v58 = vmul.f32 %v1511_v40, %v2977_v7  ;;  %v922_v59 = vmul.f32 %v1476_v41, %v2971_v6  ;;  %v1436_v9 = vld [vmem:[%s3224_s3 + $0x370] sm:$0xff]  ;;  %v1497_v26 = vld [vmem:[%s3224_s3 + $0x438] sm:$0xff] }
  0xa2   :  { %v833_v1 = vadd.f32 %v1441_v46, %v816_v61  ;;  %v817_v2 = vmul.f32 %v1705_v56, %v1434_v47  ;;  %1714 = vtanh.f32 %v1027_v49  ;;  %v1028_v45 = vadd.f32 %v1020_v39, %v974_v50  ;;  %v1444_v28 = vld [vmem:[%s3224_s3 + $0x3b0] sm:$0xff]  ;;  %v1515_v30 = vld [vmem:[%s3224_s3 + $0x478] sm:$0xff]  ;;  %v1533_v46 = vld [vmem:[%s3224_s3 + $0x488] sm:$0xff] }
  0xa3   :  { %1456 = vst.msk [vmem:[%s3226_s5 + $0x90] sm:$0xff] %vm319_vm1, %v832_v38  ;;  %v975_v5 = vadd.f32 %v967_v52, %v921_v25  ;;  %v968_v8 = vmul.f32 %v1494_v33, %v2974_v42  ;;  %v1022_v3 = vmul.f32 %v1512_v53, %v2977_v7  ;;  %v923_v10 = vmul.f32 %v1477_v55, %v2971_v6  ;;  %v1445_v62 = vld [vmem:[%s3224_s3 + $0x3b8] sm:$0xff]  ;;  %v1540_v25 = vld [vmem:[%s3224_s3 + $0x4c0] sm:$0xff]  ;;  %v1541_v49 = vld [vmem:[%s3224_s3 + $0x4c8] sm:$0xff] }
  0xa4   :  { %v1707_v15 = vpop.eup %1706  ;;  %1457 = vst.msk [vmem:[%s3226_s5 + $0x98] sm:$0xff] %vm319_vm1, %v833_v1  ;;  %v834_v16 = vadd.f32 %v1442_v57, %v817_v2  ;;  %1716 = vtanh.f32 %v1028_v45  ;;  %v969_v18 = vmul.f32 %v1495_v63, %v2974_v42  ;;  %v1023_v19 = vmul.f32 %v1513_v0, %v2977_v7  ;;  %v1534_v50 = vld [vmem:[%s3224_s3 + $0x490] sm:$0xff]  ;;  %v1543_v0 = vld [vmem:[%s3224_s3 + $0x4d8] sm:$0xff]  ;;  %v1536_v1 = vld [vmem:[%s3224_s3 + $0x4a0] sm:$0xff] }
  0xa5   :  { %v818_v20 = vmul.f32 %v1707_v15, %v1435_v4  ;;  %v1029_v22 = vadd.f32 %v1021_v58, %v975_v5  ;;  %v976_v23 = vadd.f32 %v968_v8, %v922_v59  ;;  %v924_v24 = vmul.f32 %v1478_v14, %v2971_v6  ;;  %v1542_v56 = vld [vmem:[%s3224_s3 + $0x4d0] sm:$0xff]  ;;  %v1535_v58 = vld [vmem:[%s3224_s3 + $0x498] sm:$0xff]  ;;  %v1537_v4 = vld [vmem:[%s3224_s3 + $0x4a8] sm:$0xff] }
  0xa6   :  { %v1709_v27 = vpop.eup %1708  ;;  %1458 = vst.msk [vmem:[%s3226_s5 + $0xa0] sm:$0xff] %vm319_vm1, %v834_v16  ;;  %v977_v34 = vadd.f32 %v969_v18, %v923_v10  ;;  %v970_v35 = vmul.f32 %v1496_v11, %v2974_v42  ;;  %v1024_v60 = vmul.f32 %v1514_v12, %v2977_v7  ;;  %v925_v29 = vmul.f32 %v1479_v13, %v2971_v6  ;;  %v1544_v14 = vld [vmem:[%s3224_s3 + $0x4e0] sm:$0xff]  ;;  %v1545_v10 = vld [vmem:[%s3224_s3 + $0x4e8] sm:$0xff]  ;;  %v1538_v11 = vld [vmem:[%s3224_s3 + $0x4b0] sm:$0xff] }
  0xa7   :  { %v1711_v31 = vpop.eup %1710  ;;  %v835_v32 = vadd.f32 %v1443_v17, %v818_v20  ;;  %v819_v54 = vmul.f32 %v1709_v27, %v1436_v9  ;;  %1718 = vtanh.f32 %v1029_v22  ;;  %v1030_v36 = vadd.f32 %v1022_v3, %v976_v23  ;;  %v1546_v16 = vld [vmem:[%s3224_s3 + $0x4f0] sm:$0xff]  ;;  %v1539_v17 = vld [vmem:[%s3224_s3 + $0x4b8] sm:$0xff] }
  0xa8   :  { %v820_v37 = vmul.f32 %v1711_v31, %v1437_v21  ;;  %v1031_v39 = vadd.f32 %v1023_v19, %v977_v34  ;;  %v978_v40 = vadd.f32 %v970_v35, %v924_v24  ;;  %v971_v41 = vmul.f32 %v1497_v26, %v2974_v42  ;;  %v1547_v20 = vld [vmem:[%s3224_s3 + $0x4f8] sm:$0xff] }
  0xa9   :  { %1459 = vst.msk [vmem:[%s3226_s5 + $0xa8] sm:$0xff] %vm319_vm1, %v835_v32  ;;  %v836_v6 = vadd.f32 %v1444_v28, %v819_v54  ;;  %1720 = vtanh.f32 %v1030_v36  ;;  %v1025_v43 = vmul.f32 %v1515_v30, %v2977_v7 }
  0xaa   :  { %v837_v44 = vadd.f32 %v1445_v62, %v820_v37  ;;  %1722 = vtanh.f32 %v1031_v39  ;;  %v1032_v42 = vadd.f32 %v1024_v60, %v978_v40  ;;  %v979_v47 = vadd.f32 %v971_v41, %v925_v29 }
  0xab   :  { %v1713_v48 = vpop.eup %1712  ;;  %1460 = vst.msk [vmem:[%s3226_s5 + $0xb0] sm:$0xff] %vm319_vm1, %v836_v6 }
  0xac   :  { %v1715_v61 = vpop.eup %1714  ;;  %1461 = vst.msk [vmem:[%s3226_s5 + $0xb8] sm:$0xff] %vm319_vm1, %v837_v44  ;;  %v1093_v7 = vmul.f32 %v1713_v48, %v1532_v51  ;;  %1724 = vtanh.f32 %v1032_v42  ;;  %v1033_v52 = vadd.f32 %v1025_v43, %v979_v47 }
  0xad   :  { %v1094_v33 = vmul.f32 %v1715_v61, %v1533_v46 }
  0xae   :  { %v1717_v53 = vpop.eup %1716  ;;  %v1110_v55 = vadd.f32 %v1540_v25, %v1093_v7  ;;  %1726 = vtanh.f32 %v1033_v52 }
  0xaf   :  { %v1111_v38 = vadd.f32 %v1541_v49, %v1094_v33  ;;  %v1095_v57 = vmul.f32 %v1717_v53, %v1534_v50 }
  0xb0   :  { %1556 = vst.msk [vmem:[%s3226_s5 + $0xc0] sm:$0xff] %vm319_vm1, %v1110_v55 }
  0xb1   :  { %v1719_v59 = vpop.eup %1718  ;;  %1557 = vst.msk [vmem:[%s3226_s5 + $0xc8] sm:$0xff] %vm319_vm1, %v1111_v38  ;;  %v1112_v63 = vadd.f32 %v1542_v56, %v1095_v57 }
  0xb2   :  { %v1096_v2 = vmul.f32 %v1719_v59, %v1535_v58 }
  0xb3   :  { %v1721_v45 = vpop.eup %1720  ;;  %1558 = vst.msk [vmem:[%s3226_s5 + $0xd0] sm:$0xff] %vm319_vm1, %v1112_v63 }
  0xb4   :  { %v1723_v5 = vpop.eup %1722  ;;  %v1113_v8 = vadd.f32 %v1543_v0, %v1096_v2  ;;  %v1097_v3 = vmul.f32 %v1721_v45, %v1536_v1 }
  0xb5   :  { %v1098_v12 = vmul.f32 %v1723_v5, %v1537_v4 }
  0xb6   :  { %v1725_v13 = vpop.eup %1724  ;;  %1559 = vst.msk [vmem:[%s3226_s5 + $0xd8] sm:$0xff] %vm319_vm1, %v1113_v8  ;;  %v1114_v15 = vadd.f32 %v1544_v14, %v1097_v3 }
  0xb7   :  { %v1115_v9 = vadd.f32 %v1545_v10, %v1098_v12  ;;  %v1099_v18 = vmul.f32 %v1725_v13, %v1538_v11 }
  0xb8   :  { %v1727_v19 = vpop.eup %1726  ;;  %1560 = vst.msk [vmem:[%s3226_s5 + $0xe0] sm:$0xff] %vm319_vm1, %v1114_v15 }
  0xb9   :  { %1561 = vst.msk [vmem:[%s3226_s5 + $0xe8] sm:$0xff] %vm319_vm1, %v1115_v9  ;;  %v1116_v21 = vadd.f32 %v1546_v16, %v1099_v18  ;;  %v1100_v22 = vmul.f32 %v1727_v19, %v1539_v17 }
  0xbb   :  { %1562 = vst.msk [vmem:[%s3226_s5 + $0xf0] sm:$0xff] %vm319_vm1, %v1116_v21  ;;  %v1117_v23 = vadd.f32 %v1547_v20, %v1100_v22 }
  0xbd   :  { %1563 = vst.msk [vmem:[%s3226_s5 + $0xf8] sm:$0xff] %vm319_vm1, %v1117_v23 }
  0xbe   :  { %1764 = dma.done.wait [#allocation3], 2048  }
  0xbf   :  { %1765 = vsyncadd [#allocation3], 4294965248 }
  0xc0   :  { %1187 = vsyncpa [#allocation3], 1 }
  0xc1   :  { %1188 = vsyncpa [#allocation4], 1 }

</bundles_post_ra>
